<compile_context>
chip_gen: v7x
topology: tpu7x:2x2x1
jax: 0.10.0
libtpu: 0.0.40
codegen_flags: <defaults>
</compile_context>

<pallas_src>
import jax
import jax.numpy as jnp
import numpy as np
from jax import lax
from jax.experimental import pallas as pl
from jax.experimental.pallas import tpu as pltpu


def _round_up(x, m):
    return ((x + m - 1) // m) * m


def _vmem_bytes_estimate(btile, L, P_pad, D_pad, C_pad, single_buffer_weights=True):
    bf16, f32 = 2, 4
    n_wbuf = 1 if single_buffer_weights else 2
    patches = 2 * btile * L * P_pad * bf16                      # dbl-buffered input tile
    out = 2 * btile * C_pad * f32                               # dbl-buffered output tile
    weights = n_wbuf * (P_pad * D_pad + D_pad * C_pad) * bf16   # grid-invariant weights
    interm = btile * L * (D_pad + C_pad) * f32                  # raw / sim f32 values
    return patches + out + weights + 2 * interm                 # 2x slack for z/e temps


def clip_sd_kernel(patches_ref, wpatch_ref, txt_t_ref, scale_ref, out_ref):
    # patches_ref: (btile*L, P_pad) bf16  -- btile images' patches stacked (big M)
    # wpatch_ref:  (P_pad, D_pad)   bf16
    # txt_t_ref:   (D_pad, C_pad)   bf16  (pre-normalized, pre-transposed)
    # scale_ref:   (2,)             f32 SMEM: [exp(logit_scale), 1/exp(logit_scale)]
    # out_ref:     (btile, C_pad)   f32
    scale = scale_ref[0]
    inv_scale = scale_ref[1]
    bt, cp = out_ref.shape
    L = patches_ref.shape[0] // bt

    # Patch embedding (stand-in for encode_image patch tokens): one big-M
    # bf16 MXU matmul with f32 accumulation.
    raw = jnp.dot(patches_ref[...], wpatch_ref[...],
                  preferred_element_type=jnp.float32)               # (bt*L, D_pad)

    # Fold image_features / ||image_features|| into the similarity; guard the
    # all-zero padded-batch rows so no 0*inf NaNs are produced.
    norm2 = jnp.sum(raw * raw, axis=-1, keepdims=True)              # (bt*L, 1)
    rinv = jnp.where(norm2 > 0.0, lax.rsqrt(norm2), 0.0)

    # Cosine similarity against pre-normalized, pre-transposed text features:
    # canonical (M,K)x(K,N) -> no in-kernel relayout of the RHS.
    sim = jnp.dot(raw.astype(jnp.bfloat16), txt_t_ref[...],
                  preferred_element_type=jnp.float32)               # (bt*L, C_pad)

    # Fused softmax-over-patches + output reduction:
    #   coeff = softmax(scale*s, axis=L);  out = sum_l coeff*s
    #         = (sum_l e*z) / (sum_l e) / scale,  z = scale*s = sim*(rinv*scale)
    z = (sim * (rinv * scale)).reshape(bt, L, cp)                   # (bt, L, C_pad)
    m = jnp.max(z, axis=1, keepdims=True)
    e = jnp.exp(z - m)
    num = jnp.sum(e * z, axis=1)                                    # (bt, C_pad)
    den = jnp.sum(e, axis=1)                                        # (bt, C_pad)
    out_ref[...] = num * pl.reciprocal(den, approx=True) * inv_scale


def clip_sd_forward(image, w_patch, text_features, logit_scale, patch=4, btile=8):
    B, Ci, H, W = image.shape
    assert H % patch == 0 and W % patch == 0
    L = (H // patch) * (W // patch)
    P = Ci * patch * patch
    assert w_patch.shape[0] == P
    D = w_patch.shape[1]
    C = text_features.shape[0]

    # btile multiple of 8 -> sublane-dense output block and (btile*L) % 8 == 0.
    assert btile % 8 == 0
    P_pad = _round_up(P, 128)
    D_pad = _round_up(D, 128)
    C_pad = _round_up(C, 128)
    B_pad = _round_up(B, btile)

    # Cast to bf16 BEFORE the memory-bound patchification shuffle (halves its
    # HBM traffic); the kernel matmul operands are bf16 anyway.
    img = image.astype(jnp.bfloat16)
    patches = img.reshape(B, Ci, H // patch, patch, W // patch, patch)
    patches = patches.transpose(0, 2, 4, 1, 3, 5).reshape(B, L, P)
    patches = jnp.pad(patches, ((0, B_pad - B), (0, 0), (0, P_pad - P)))
    # Flatten (B_pad, L) -> one big M axis so each grid step issues ONE
    # (btile*L, P_pad) x (P_pad, D_pad) matmul.
    patches2d = patches.reshape(B_pad * L, P_pad)

    # Zero-pad W_patch; padded rows/cols contribute zero.
    wp = jnp.pad(w_patch.astype(jnp.float32),
                 ((0, P_pad - P), (0, D_pad - D))).astype(jnp.bfloat16)

    # Frozen text features: normalize once on the host, zero-pad, and
    # pre-transpose to (D_pad, C_pad).
    txt = text_features.astype(jnp.float32)
    txt = txt / jnp.linalg.norm(txt, axis=-1, keepdims=True)
    txt_t = jnp.pad(txt, ((0, C_pad - C), (0, D_pad - D))).T.astype(jnp.bfloat16)

    # exp(logit_scale) and its inverse hoisted out of the kernel.
    scale = jnp.exp(jnp.asarray(logit_scale, jnp.float32))
    scale_arr = jnp.stack([scale, 1.0 / scale]).astype(jnp.float32)   # (2,)

    grid = (B_pad // btile,)   # on v7x pick btile so len(grid) >= 2 for real batches

    def build(single_buffer_weights):
        est = _vmem_bytes_estimate(btile, L, P_pad, D_pad, C_pad,
                                   single_buffer_weights)
        vmem_limit = int(min(48 << 20, max(32 << 20, 2 * est)))
        wkw = ({"pipeline_mode": pl.Buffered(1)}
               if single_buffer_weights else {})
        return pl.pallas_call(
            clip_sd_kernel,
            out_shape=jax.ShapeDtypeStruct((B_pad, C_pad), jnp.float32),
            grid=grid,
            in_specs=[
                pl.BlockSpec((btile * L, P_pad), lambda b: (b, 0)),
                pl.BlockSpec((P_pad, D_pad), lambda b: (0, 0), **wkw),
                pl.BlockSpec((D_pad, C_pad), lambda b: (0, 0), **wkw),
                pl.BlockSpec(memory_space=pltpu.MemorySpace.SMEM),
            ],
            out_specs=pl.BlockSpec((btile, C_pad), lambda b: (b, 0)),
            compiler_params=pltpu.CompilerParams(
                dimension_semantics=("parallel",),
                vmem_limit_bytes=vmem_limit),
        )

    try:
        # Grid-invariant weights: single-buffer to save VMEM (matters on v7x
        # with real ViT-sized weights).
        out = build(True)(patches2d, wp, txt_t, scale_arr)
    except Exception:
        # pipeline_mode not supported by this jax version -> default buffering.
        out = build(False)(patches2d, wp, txt_t, scale_arr)

    return out[:B, :C]


def clip_sd_reference(image, w_patch, text_features, logit_scale, patch=4):
    """Pure-JAX reference: original unfused CLIP_SD math, with the matmul
    operands rounded to bf16 at the same points as the kernel (so the
    comparison isolates the Pallas mechanics / fusion, not the intentional
    bf16 MXU approximation)."""
    B, Ci, H, W = image.shape
    L = (H // patch) * (W // patch)
    P = Ci * patch * patch
    patches = image.reshape(B, Ci, H // patch, patch, W // patch, patch)
    patches = patches.transpose(0, 2, 4, 1, 3, 5).reshape(B, L, P)
    patches = patches.astype(jnp.bfloat16).astype(jnp.float32)
    wp = w_patch.astype(jnp.bfloat16).astype(jnp.float32)

    img = jnp.einsum("blp,pd->bld", patches, wp,
                     precision=lax.Precision.HIGHEST)                 # (B, L, D)
    inorm = jnp.linalg.norm(img, axis=-1, keepdims=True)
    img_n = img / inorm

    txt = text_features.astype(jnp.float32)
    txt = txt / jnp.linalg.norm(txt, axis=-1, keepdims=True)
    txt = txt.astype(jnp.bfloat16).astype(jnp.float32)

    # Kernel rounds the un-normalized embeddings to bf16 before this matmul
    # and rescales by 1/||img|| afterwards; mirror that rounding point.
    img_q = img.astype(jnp.bfloat16).astype(jnp.float32)
    sim = jnp.einsum("bld,cd->blc", img_q, txt,
                     precision=lax.Precision.HIGHEST) / inorm          # (B, L, C)

    scale = jnp.exp(jnp.asarray(logit_scale, jnp.float32))
    coeff = jax.nn.softmax(scale * sim, axis=1)        # softmax over patches (dim=1)
    coeff = jnp.transpose(coeff, (0, 2, 1))            # (B, C, L)
    sd = jnp.einsum("bcl,bld->bcd", coeff, img_n,
                    precision=lax.Precision.HIGHEST)   # (B, C, D)
    return jnp.sum(sd * txt[None], axis=-1)            # (B, C)


if __name__ == "__main__":
    # Small, deterministic shapes.
    B, Ci, H, W = 2, 3, 16, 16
    patch = 4
    D = 64            # embedding dim
    num_classes = 8

    key = jax.random.PRNGKey(0)
    k_img, k_w, k_txt = jax.random.split(key, 3)

    image = jax.random.normal(k_img, (B, Ci, H, W), jnp.float32)
    # Deterministic parameters (stand-ins for frozen CLIP weights):
    w_patch = 0.05 * jax.random.normal(k_w, (Ci * patch * patch, D), jnp.float32)
    text_features = jax.random.normal(k_txt, (num_classes, D), jnp.float32)
    logit_scale = jnp.float32(np.log(1.0 / 0.07))   # CLIP's init value

    out = clip_sd_forward(image, w_patch, text_features, logit_scale,
                          patch=patch, btile=8)
    out = jax.block_until_ready(out)

    ref = clip_sd_reference(image, w_patch, text_features, logit_scale, patch=patch)
    ref = jax.block_until_ready(ref)

    assert out.shape == (B, num_classes)
    # Tolerance covers the approx reciprocal / rsqrt and accumulation-order
    # differences (the bf16 operand rounding is mirrored in the reference).
    np.testing.assert_allclose(np.asarray(out), np.asarray(ref), rtol=3e-2, atol=5e-3)
    print("KERNEL_OK")
</pallas_src>

<mosaic_0001>
module attributes {stable_mosaic.version = 11 : i64} {
  func.func @clip_sd_kernel(%arg0: i32, %arg1: memref<128x128xbf16, #tpu.memory_space<vmem>>, %arg2: memref<128x128xbf16, #tpu.memory_space<vmem>>, %arg3: memref<128x128xbf16, #tpu.memory_space<vmem>>, %arg4: memref<2xf32, #tpu.memory_space<smem>>, %arg5: memref<8x128xf32, #tpu.memory_space<vmem>>) attributes {dimension_semantics = [#tpu.dimension_semantics<parallel>], iteration_bounds = array<i64: 1>, scalar_prefetch = 0 : i64, scratch_operands = 0 : i64, tpu.core_type = #tpu.core_type<tc>, window_params = [{transform_indices = @transform_0, window_bounds = array<i64: 128, 128>}, {pipeline_mode = #tpu.pipeline_mode<synchronous>, transform_indices = @transform_1, window_bounds = array<i64: 128, 128>}, {pipeline_mode = #tpu.pipeline_mode<synchronous>, transform_indices = @transform_2, window_bounds = array<i64: 128, 128>}, {transform_indices = @transform_3, window_bounds = array<i64: 2>}, {transform_indices = @transform_4, window_bounds = array<i64: 8, 128>}]} {
    %c0 = arith.constant 0 : index
    %0 = memref.load %arg4[%c0] : memref<2xf32, #tpu.memory_space<smem>>
    %c1 = arith.constant 1 : index
    %1 = memref.load %arg4[%c1] : memref<2xf32, #tpu.memory_space<smem>>
    %c0_0 = arith.constant 0 : index
    %c0_1 = arith.constant 0 : index
    %2 = vector.load %arg1[%c0_0, %c0_1] : memref<128x128xbf16, #tpu.memory_space<vmem>>, vector<128x128xbf16>
    %c0_2 = arith.constant 0 : index
    %c0_3 = arith.constant 0 : index
    %3 = vector.load %arg2[%c0_2, %c0_3] : memref<128x128xbf16, #tpu.memory_space<vmem>>, vector<128x128xbf16>
    %cst = arith.constant dense<0.000000e+00> : vector<128x128xf32>
    %4 = tpu.matmul %2, %3, %cst {dimension_numbers = #tpu.dot_dimension_numbers<[1], [0], [0], [1], [0, 0, 1, 1], [], []>} : vector<128x128xbf16>, vector<128x128xbf16>, vector<128x128xf32> -> vector<128x128xf32>
    %5 = arith.mulf %4, %4 : vector<128x128xf32>
    %cst_4 = arith.constant dense<0.000000e+00> : vector<128xf32>
    %6 = vector.multi_reduction <add>, %5, %cst_4 [1] : vector<128x128xf32> to vector<128xf32>
    %7 = vector.shape_cast %6 : vector<128xf32> to vector<128x1xf32>
    %cst_5 = arith.constant 0.000000e+00 : f32
    %8 = vector.broadcast %cst_5 : f32 to vector<128x1xf32>
    %9 = arith.cmpf ogt, %7, %8 : vector<128x1xf32>
    %10 = math.rsqrt %7 : vector<128x1xf32>
    %cst_6 = arith.constant 0.000000e+00 : f32
    %11 = vector.broadcast %cst_6 : f32 to vector<128x1xf32>
    %12 = arith.select %9, %10, %11 : vector<128x1xi1>, vector<128x1xf32>
    %13 = arith.truncf %4 : vector<128x128xf32> to vector<128x128xbf16>
    %c0_7 = arith.constant 0 : index
    %c0_8 = arith.constant 0 : index
    %14 = vector.load %arg3[%c0_7, %c0_8] : memref<128x128xbf16, #tpu.memory_space<vmem>>, vector<128x128xbf16>
    %cst_9 = arith.constant dense<0.000000e+00> : vector<128x128xf32>
    %15 = tpu.matmul %13, %14, %cst_9 {dimension_numbers = #tpu.dot_dimension_numbers<[1], [0], [0], [1], [0, 0, 1, 1], [], []>} : vector<128x128xbf16>, vector<128x128xbf16>, vector<128x128xf32> -> vector<128x128xf32>
    %16 = vector.broadcast %0 : f32 to vector<128x1xf32>
    %17 = arith.mulf %12, %16 : vector<128x1xf32>
    %18 = vector.broadcast %17 : vector<128x1xf32> to vector<128x128xf32>
    %19 = arith.mulf %15, %18 : vector<128x128xf32>
    %20 = vector.shape_cast %19 : vector<128x128xf32> to vector<8x16x128xf32>
    %cst_10 = arith.constant dense<0xFF800000> : vector<8x128xf32>
    %21 = vector.multi_reduction <maximumf>, %20, %cst_10 [1] : vector<8x16x128xf32> to vector<8x128xf32>
    %22 = vector.shape_cast %21 : vector<8x128xf32> to vector<8x1x128xf32>
    %23 = vector.broadcast %22 : vector<8x1x128xf32> to vector<8x16x128xf32>
    %24 = arith.subf %20, %23 : vector<8x16x128xf32>
    %25 = math.exp %24 : vector<8x16x128xf32>
    %26 = arith.mulf %25, %20 : vector<8x16x128xf32>
    %cst_11 = arith.constant dense<0.000000e+00> : vector<8x128xf32>
    %27 = vector.multi_reduction <add>, %26, %cst_11 [1] : vector<8x16x128xf32> to vector<8x128xf32>
    %cst_12 = arith.constant dense<0.000000e+00> : vector<8x128xf32>
    %28 = vector.multi_reduction <add>, %25, %cst_12 [1] : vector<8x16x128xf32> to vector<8x128xf32>
    %29 = tpu.reciprocal %28 {approx = true} : vector<8x128xf32> -> vector<8x128xf32>
    %30 = arith.mulf %27, %29 : vector<8x128xf32>
    %31 = vector.broadcast %1 : f32 to vector<8x128xf32>
    %32 = arith.mulf %30, %31 : vector<8x128xf32>
    %c0_13 = arith.constant 0 : index
    %c0_14 = arith.constant 0 : index
    %33 = vector.load %arg5[%c0_13, %c0_14] : memref<8x128xf32, #tpu.memory_space<vmem>>, vector<8x128xf32>
    tpu.vector_store %arg5[%c0_13, %c0_14], %32 {strides = array<i32>} : memref<8x128xf32, #tpu.memory_space<vmem>>, vector<8x128xf32>,
    return
  }
  func.func @transform_0(%arg0: i32) -> (i32, i32) {
    %c0_i32 = arith.constant 0 : i32
    %c0_i32_0 = arith.constant 0 : i32
    return %arg0, %c0_i32 : i32, i32
  }
  func.func @transform_1(%arg0: i32) -> (i32, i32) {
    %c0_i32 = arith.constant 0 : i32
    %c0_i32_0 = arith.constant 0 : i32
    %c0_i32_1 = arith.constant 0 : i32
    return %c0_i32, %c0_i32_0 : i32, i32
  }
  func.func @transform_2(%arg0: i32) -> (i32, i32) {
    %c0_i32 = arith.constant 0 : i32
    %c0_i32_0 = arith.constant 0 : i32
    %c0_i32_1 = arith.constant 0 : i32
    return %c0_i32, %c0_i32_0 : i32, i32
  }
  func.func @transform_3(%arg0: i32) -> i32 {
    %c0_i32 = arith.constant 0 : i32
    %c0_i32_0 = arith.constant 0 : i32
    return %c0_i32 : i32
  }
  func.func @transform_4(%arg0: i32) -> (i32, i32) {
    %c0_i32 = arith.constant 0 : i32
    %c0_i32_0 = arith.constant 0 : i32
    return %arg0, %c0_i32 : i32, i32
  }
}

module attributes {stable_mosaic.version = 11 : i64} {
  func.func @clip_sd_kernel(%arg0: i32, %arg1: memref<128x128xbf16, #tpu.memory_space<vmem>>, %arg2: memref<128x128xbf16, #tpu.memory_space<vmem>>, %arg3: memref<128x128xbf16, #tpu.memory_space<vmem>>, %arg4: memref<2xf32, #tpu.memory_space<smem>>, %arg5: memref<8x128xf32, #tpu.memory_space<vmem>>) attributes {dimension_semantics = [#tpu.dimension_semantics<parallel>], iteration_bounds = array<i64: 1>, scalar_prefetch = 0 : i64, scratch_operands = 0 : i64, tpu.core_type = #tpu.core_type<tc>, window_params = [{transform_indices = @transform_0, window_bounds = array<i64: 128, 128>}, {pipeline_mode = #tpu.pipeline_mode<synchronous>, transform_indices = @transform_1, window_bounds = array<i64: 128, 128>}, {pipeline_mode = #tpu.pipeline_mode<synchronous>, transform_indices = @transform_2, window_bounds = array<i64: 128, 128>}, {transform_indices = @transform_3, window_bounds = array<i64: 2>}, {transform_indices = @transform_4, window_bounds = array<i64: 8, 128>}]} {
    %c0 = arith.constant 0 : index
    %0 = memref.load %arg4[%c0] : memref<2xf32, #tpu.memory_space<smem>>
    %c1 = arith.constant 1 : index
    %1 = memref.load %arg4[%c1] : memref<2xf32, #tpu.memory_space<smem>>
    %c0_0 = arith.constant 0 : index
    %c0_1 = arith.constant 0 : index
    %2 = vector.load %arg1[%c0_0, %c0_1] : memref<128x128xbf16, #tpu.memory_space<vmem>>, vector<128x128xbf16>
    %c0_2 = arith.constant 0 : index
    %c0_3 = arith.constant 0 : index
    %3 = vector.load %arg2[%c0_2, %c0_3] : memref<128x128xbf16, #tpu.memory_space<vmem>>, vector<128x128xbf16>
    %cst = arith.constant dense<0.000000e+00> : vector<128x128xf32>
    %4 = tpu.matmul %2, %3, %cst {dimension_numbers = #tpu.dot_dimension_numbers<[1], [0], [0], [1], [0, 0, 1, 1], [], []>} : vector<128x128xbf16>, vector<128x128xbf16>, vector<128x128xf32> -> vector<128x128xf32>
    %5 = arith.mulf %4, %4 : vector<128x128xf32>
    %cst_4 = arith.constant dense<0.000000e+00> : vector<128xf32>
    %6 = vector.multi_reduction <add>, %5, %cst_4 [1] : vector<128x128xf32> to vector<128xf32>
    %7 = vector.shape_cast %6 : vector<128xf32> to vector<128x1xf32>
    %cst_5 = arith.constant 0.000000e+00 : f32
    %8 = vector.broadcast %cst_5 : f32 to vector<128x1xf32>
    %9 = arith.cmpf ogt, %7, %8 : vector<128x1xf32>
    %10 = math.rsqrt %7 : vector<128x1xf32>
    %cst_6 = arith.constant 0.000000e+00 : f32
    %11 = vector.broadcast %cst_6 : f32 to vector<128x1xf32>
    %12 = arith.select %9, %10, %11 : vector<128x1xi1>, vector<128x1xf32>
    %13 = arith.truncf %4 : vector<128x128xf32> to vector<128x128xbf16>
    %c0_7 = arith.constant 0 : index
    %c0_8 = arith.constant 0 : index
    %14 = vector.load %arg3[%c0_7, %c0_8] : memref<128x128xbf16, #tpu.memory_space<vmem>>, vector<128x128xbf16>
    %cst_9 = arith.constant dense<0.000000e+00> : vector<128x128xf32>
    %15 = tpu.matmul %13, %14, %cst_9 {dimension_numbers = #tpu.dot_dimension_numbers<[1], [0], [0], [1], [0, 0, 1, 1], [], []>} : vector<128x128xbf16>, vector<128x128xbf16>, vector<128x128xf32> -> vector<128x128xf32>
    %16 = vector.broadcast %0 : f32 to vector<128x1xf32>
    %17 = arith.mulf %12, %16 : vector<128x1xf32>
    %18 = vector.broadcast %17 : vector<128x1xf32> to vector<128x128xf32>
    %19 = arith.mulf %15, %18 : vector<128x128xf32>
    %20 = vector.shape_cast %19 : vector<128x128xf32> to vector<8x16x128xf32>
    %cst_10 = arith.constant dense<0xFF800000> : vector<8x128xf32>
    %21 = vector.multi_reduction <maximumf>, %20, %cst_10 [1] : vector<8x16x128xf32> to vector<8x128xf32>
    %22 = vector.shape_cast %21 : vector<8x128xf32> to vector<8x1x128xf32>
    %23 = vector.broadcast %22 : vector<8x1x128xf32> to vector<8x16x128xf32>
    %24 = arith.subf %20, %23 : vector<8x16x128xf32>
    %25 = math.exp %24 : vector<8x16x128xf32>
    %26 = arith.mulf %25, %20 : vector<8x16x128xf32>
    %cst_11 = arith.constant dense<0.000000e+00> : vector<8x128xf32>
    %27 = vector.multi_reduction <add>, %26, %cst_11 [1] : vector<8x16x128xf32> to vector<8x128xf32>
    %cst_12 = arith.constant dense<0.000000e+00> : vector<8x128xf32>
    %28 = vector.multi_reduction <add>, %25, %cst_12 [1] : vector<8x16x128xf32> to vector<8x128xf32>
    %29 = tpu.reciprocal %28 {approx = true} : vector<8x128xf32> -> vector<8x128xf32>
    %30 = arith.mulf %27, %29 : vector<8x128xf32>
    %31 = vector.broadcast %1 : f32 to vector<8x128xf32>
    %32 = arith.mulf %30, %31 : vector<8x128xf32>
    %c0_13 = arith.constant 0 : index
    %c0_14 = arith.constant 0 : index
    %33 = vector.load %arg5[%c0_13, %c0_14] : memref<8x128xf32, #tpu.memory_space<vmem>>, vector<8x128xf32>
    tpu.vector_store %arg5[%c0_13, %c0_14], %32 {strides = array<i32>} : memref<8x128xf32, #tpu.memory_space<vmem>>, vector<8x128xf32>,
    return
  }
  func.func @transform_0(%arg0: i32) -> (i32, i32) {
    %c0_i32 = arith.constant 0 : i32
    %c0_i32_0 = arith.constant 0 : i32
    return %arg0, %c0_i32 : i32, i32
  }
  func.func @transform_1(%arg0: i32) -> (i32, i32) {
    %c0_i32 = arith.constant 0 : i32
    %c0_i32_0 = arith.constant 0 : i32
    %c0_i32_1 = arith.constant 0 : i32
    return %c0_i32, %c0_i32_0 : i32, i32
  }
  func.func @transform_2(%arg0: i32) -> (i32, i32) {
    %c0_i32 = arith.constant 0 : i32
    %c0_i32_0 = arith.constant 0 : i32
    %c0_i32_1 = arith.constant 0 : i32
    return %c0_i32, %c0_i32_0 : i32, i32
  }
  func.func @transform_3(%arg0: i32) -> i32 {
    %c0_i32 = arith.constant 0 : i32
    %c0_i32_0 = arith.constant 0 : i32
    return %c0_i32 : i32
  }
  func.func @transform_4(%arg0: i32) -> (i32, i32) {
    %c0_i32 = arith.constant 0 : i32
    %c0_i32_0 = arith.constant 0 : i32
    return %arg0, %c0_i32 : i32, i32
  }
}

</mosaic_0001>

<bundles_post_ra>
// kernel: tpu_custom_call.1
= control target key start
LH: loop header
LB: loop body
LE: loop exit
PB: predicated region body
PF: predicated region fallthrough
CT: control target
= control target key end

     0   :  { %9 = vsyncpa [#allocation3], 0  ;;  %s1507_s0 = inlined_call_operand.hbm [shape: bf16[128,128], index: 0, kind: input, shape index: {}]   ;;  %s1508_s1 = inlined_call_operand.hbm [shape: bf16[128,128], index: 1, kind: input, shape index: {}]   ;;  %s1509_s2 = inlined_call_operand.hbm [shape: bf16[128,128], index: 2, kind: input, shape index: {}]   ;;  %s1510_s3 = inlined_call_operand.vmem [shape: f32[2], index: 3, kind: input, shape index: {}]   ;;  %s1511_s4 = inlined_call_operand.hbm [shape: f32[8,128], index: 4, kind: output, shape index: {}]  }
   0x1   :  { %10 = vsyncpa [#allocation7], 0 }
   0x2   :  { %11 = vsyncpa [#allocation5], 0 }
   0x3   :  { %12 = vsyncpa [#allocation4], 0  ;;  %s1236_s15 = smov [#allocation6]   ;;  %s1237_s17 = smov [#allocation2]  }
   0x4   :  { %s30_s16 = sshll.u32 %s1236_s15, 4  ;;  %s18_s18 = sshll.u32 %s1237_s17, 4  ;;  %s31_s16 = int_to_ptr.vmem [resolvable:$true] %s30_s16  ;;  %s1268_s18 = int_to_ptr.vmem [resolvable:$true] %s18_s18 }
   0x5   :  { %s1128_s21 = scalar_lea.hbm %s1508_s1, 1024 }
   0x6   :  { %p1129_p0 = scmp.ne.s32.totalorder %s1508_s1, %s1128_s21  ;;  %p1132_p1 = scmp.lt.u32.totalorder %s1128_s21, %s1508_s1 }
   0x8   :  { %p1134_p2 = pnand %p1132_p1, %p1129_p0 }
   0xa   :  { %1137 = shalt.err (!%p1134_p2)
}
   0xb   :  { %s1138_s26 = scalar_lea.vmem %s31_s16, 1024  ;;  %p1143_p4 = scmp.lt.s32.totalorder %s31_s16, %s31_s16 }
   0xc   :  { %p1139_p3 = scmp.ne.s32.totalorder %s31_s16, %s1138_s26  ;;  %p1144_p5 = scmp.lt.s32.totalorder %s1138_s26, %s1138_s26 }
   0xe   :  { %p1145_p6 = por %p1144_p5, %p1143_p4 }
  0x10   :  { %p1146_p7 = pnand %p1145_p6, %p1139_p3 }
  0x12   :  { %1149 = shalt.err (!%p1146_p7)
}
  0x13   :  { %s1238_s27 = smov 64   ;;  %s1239_s28 = smov 4  }
  0x14   :  { %36 = dma.hbm_to_vmem [thread:$0]  %s1508_s1, 1024, %s31_s16, [#allocation7], %s1238_s27, %s1238_s27, %s1239_s28  }
  0x15   :  { %s1150_s7 = scalar_lea.hbm %s1507_s0, 1024 }
  0x16   :  { %p1151_p8 = scmp.ne.s32.totalorder %s1507_s0, %s1150_s7  ;;  %p1154_p9 = scmp.lt.u32.totalorder %s1150_s7, %s1507_s0 }
  0x18   :  { %p1156_p10 = pnand %p1154_p9, %p1151_p8 }
  0x1a   :  { %1159 = shalt.err (!%p1156_p10)
}
  0x1b   :  { %s1160_s12 = scalar_lea.vmem %s1268_s18, 1024  ;;  %p1165_p12 = scmp.lt.s32.totalorder %s1268_s18, %s1268_s18 }
  0x1c   :  { %p1161_p11 = scmp.ne.s32.totalorder %s1268_s18, %s1160_s12  ;;  %p1166_p13 = scmp.lt.s32.totalorder %s1160_s12, %s1160_s12 }
  0x1e   :  { %p1167_p0 = por %p1166_p13, %p1165_p12 }
  0x20   :  { %p1168_p1 = pnand %p1167_p0, %p1161_p11 }
  0x22   :  { %1171 = shalt.err (!%p1168_p1)
}
  0x23   :  { %24 = dma.hbm_to_vmem [thread:$0]  %s1507_s0, 1024, %s1268_s18, [#allocation3], %s1238_s27, %s1238_s27, %s1239_s28  }
  0x24   :  { %s55_s16 = sshll.u32 %s1510_s3, 4  ;;  %s1240_s17 = smov [#allocation8]   ;;  %s56_s16 = int_to_ptr.vmem [resolvable:$true] %s55_s16 }
  0x25   :  { %s42_s19 = sshll.u32 %s1240_s17, 4  ;;  %s1172_s22 = scalar_lea.hbm %s1509_s2, 1024  ;;  %s43_s19 = int_to_ptr.vmem [resolvable:$true] %s42_s19 }
  0x26   :  { %p1173_p2 = scmp.ne.s32.totalorder %s1509_s2, %s1172_s22  ;;  %p1176_p3 = scmp.lt.u32.totalorder %s1172_s22, %s1509_s2 }
  0x28   :  { %p1178_p4 = pnand %p1176_p3, %p1173_p2 }
  0x2a   :  { %1181 = shalt.err (!%p1178_p4)
}
  0x2b   :  { %s1182_s0 = scalar_lea.vmem %s43_s19, 1024  ;;  %p1187_p6 = scmp.lt.s32.totalorder %s43_s19, %s43_s19 }
  0x2c   :  { %p1183_p5 = scmp.ne.s32.totalorder %s43_s19, %s1182_s0  ;;  %p1188_p7 = scmp.lt.s32.totalorder %s1182_s0, %s1182_s0 }
  0x2e   :  { %p1189_p8 = por %p1188_p7, %p1187_p6 }
  0x30   :  { %p1190_p9 = pnand %p1189_p8, %p1183_p5 }
  0x32   :  { %1193 = shalt.err (!%p1190_p9)
}
  0x33   :  { %48 = dma.hbm_to_vmem [thread:$0]  %s1509_s2, 1024, %s43_s19, [#allocation7], %s1238_s27, %s1238_s27, %s1239_s28  }
  0x34   :  { %s1194_s29 = scalar_lea.vmem %s56_s16, 16  ;;  %p1199_p11 = scmp.lt.s32.totalorder %s56_s16, %s56_s16 }
  0x35   :  { %p1195_p10 = scmp.ne.s32.totalorder %s56_s16, %s1194_s29  ;;  %p1200_p12 = scmp.lt.s32.totalorder %s1194_s29, %s1194_s29 }
  0x37   :  { %p1201_p13 = por %p1200_p12, %p1199_p11 }
  0x39   :  { %p1202_p0 = pnand %p1201_p13, %p1195_p10 }
  0x3b   :  { %1205 = shalt.err (!%p1202_p0)
}
  0x3c   :  { %s1241_s30 = smov [#allocation9]  }
  0x3d   :  { %58 = dma.vmem_to_smem %s56_s16, 16, %s1241_s30, [#allocation5]  }
  0x3e   :  { %1228 = dma.done.wait [#allocation3], 1024  }
  0x3f   :  { %1229 = vsyncadd [#allocation3], 4294966272 }
  0x40   :  { %1230 = dma.done.wait [#allocation7], 2048  }
  0x41   :  { %1231 = vsyncadd [#allocation7], 4294965248 }
  0x42   :  { %1232 = dma.done.wait [#allocation5], 16  }
  0x43   :  { %1233 = vsyncadd [#allocation5], 4294967280 }
  0x44   :  { %71 = sfence }
  0x45   :  { %v1024_v0 = vld [vmem:[#allocation6] sm:$0xff]   ;;  %v1025_v1 = vld [vmem:[#allocation6 + $0x8] sm:$0xff]   ;;  %v1026_v2 = vld [vmem:[#allocation6 + $0x10] sm:$0xff]   ;;  %s73_s2 = sld [smem:[#allocation9]]  ;;  %s1469_s27 = sld [smem:[#allocation9 + $0x1]] }
  0x46   :  { %953 = vmatprep.subr.bf16.mxu0 %v1024_v0  ;;  %v1027_v3 = vld [vmem:[#allocation6 + $0x18] sm:$0xff]   ;;  %v1032_v4 = vld [vmem:[#allocation2] sm:$0xff]   ;;  %v1029_v6 = vld [vmem:[#allocation6 + $0x28] sm:$0xff]   ;;  %s1242_s28 = smov [#allocation10]  }
  0x47   :  { %954 = vmatpush3.bf16.msra.mxu0 %v1024_v0  ;;  %969 = vmatprep.mubr.bf16.mxu0 %v1032_v4  ;;  %v1028_v5 = vld [vmem:[#allocation6 + $0x20] sm:$0xff]   ;;  %v1041_v8 = vld [vmem:[#allocation8 + $0x8] sm:$0xff]   ;;  %v1030_v9 = vld [vmem:[#allocation6 + $0x30] sm:$0xff]   ;;  %s885_s5 = sshll.u32 %s1242_s28, 4  ;;  %s886_s5 = int_to_ptr.vmem [resolvable:$true] %s885_s5 }
  0x48   :  { %955 = vmatprep.subr.bf16.mxu0 %v1025_v1  ;;  %v1040_v7 = vld [vmem:[#allocation8] sm:$0xff]   ;;  %v1042_v10 = vld [vmem:[#allocation8 + $0x10] sm:$0xff]   ;;  %v1031_v11 = vld [vmem:[#allocation6 + $0x38] sm:$0xff]   ;;  %s1206_s6 = scalar_lea.vmem %s886_s5, 128  ;;  %p1211_p2 = scmp.lt.s32.totalorder %s886_s5, %s886_s5 }
  0x49   :  { %985 = vmatprep.subr.bf16.mxu1 %v1040_v7  ;;  %v1043_v12 = vld [vmem:[#allocation8 + $0x18] sm:$0xff]   ;;  %v1044_v13 = vld [vmem:[#allocation8 + $0x20] sm:$0xff]   ;;  %v1033_v14 = vld [vmem:[#allocation2 + $0x8] sm:$0xff]   ;;  %p1207_p1 = scmp.ne.s32.totalorder %s886_s5, %s1206_s6  ;;  %p1212_p3 = scmp.lt.s32.totalorder %s1206_s6, %s1206_s6 }
  0x4a   :  { %986 = vmatpush3.bf16.msra.mxu1 %v1040_v7  ;;  %v1034_v15 = vld [vmem:[#allocation2 + $0x10] sm:$0xff]   ;;  %v1045_v16 = vld [vmem:[#allocation8 + $0x28] sm:$0xff]   ;;  %v1035_v18 = vld [vmem:[#allocation2 + $0x18] sm:$0xff]  }
  0x4b   :  { %956 = vmatpush3.bf16.msra.mxu0 %v1025_v1  ;;  %987 = vmatprep.subr.bf16.mxu1 %v1041_v8  ;;  %v1046_v17 = vld [vmem:[#allocation8 + $0x30] sm:$0xff]   ;;  %v1036_v19 = vld [vmem:[#allocation2 + $0x20] sm:$0xff]   ;;  %v1037_v20 = vld [vmem:[#allocation2 + $0x28] sm:$0xff]   ;;  %p1213_p4 = por %p1212_p3, %p1211_p2 }
  0x4c   :  { %957 = vmatprep.subr.bf16.mxu0 %v1026_v2  ;;  %v1038_v21 = vld [vmem:[#allocation2 + $0x30] sm:$0xff]   ;;  %v1039_v22 = vld [vmem:[#allocation2 + $0x38] sm:$0xff]  }
  0x4d   :  { %v1047_v23 = vld [vmem:[#allocation8 + $0x38] sm:$0xff]   ;;  %p1214_p5 = pnand %p1213_p4, %p1207_p1 }
  0x4e   :  { %988 = vmatpush3.bf16.msra.mxu1 %v1041_v8 }
  0x4f   :  { %958 = vmatpush3.bf16.msra.mxu0 %v1026_v2  ;;  %989 = vmatprep.subr.bf16.mxu1 %v1042_v10 }
  0x50   :  { %959 = vmatprep.subr.bf16.mxu0 %v1027_v3 }
  0x52   :  { %990 = vmatpush3.bf16.msra.mxu1 %v1042_v10 }
  0x53   :  { %960 = vmatpush3.bf16.msra.mxu0 %v1027_v3  ;;  %991 = vmatprep.subr.bf16.mxu1 %v1043_v12 }
  0x54   :  { %961 = vmatprep.subr.bf16.mxu0 %v1028_v5 }
  0x56   :  { %992 = vmatpush3.bf16.msra.mxu1 %v1043_v12 }
  0x57   :  { %962 = vmatpush3.bf16.msra.mxu0 %v1028_v5  ;;  %993 = vmatprep.subr.bf16.mxu1 %v1044_v13 }
  0x58   :  { %963 = vmatprep.subr.bf16.mxu0 %v1029_v6 }
  0x5a   :  { %994 = vmatpush3.bf16.msra.mxu1 %v1044_v13 }
  0x5b   :  { %964 = vmatpush3.bf16.msra.mxu0 %v1029_v6  ;;  %995 = vmatprep.subr.bf16.mxu1 %v1045_v16 }
  0x5c   :  { %965 = vmatprep.subr.bf16.mxu0 %v1030_v9 }
  0x5e   :  { %996 = vmatpush3.bf16.msra.mxu1 %v1045_v16 }
  0x5f   :  { %966 = vmatpush3.bf16.msra.mxu0 %v1030_v9  ;;  %997 = vmatprep.subr.bf16.mxu1 %v1046_v17 }
  0x60   :  { %967 = vmatprep.subr.bf16.mxu0 %v1031_v11 }
  0x62   :  { %998 = vmatpush3.bf16.msra.mxu1 %v1046_v17 }
  0x63   :  { %968 = vmatpush3.bf16.msra.mxu0 %v1031_v11  ;;  %999 = vmatprep.subr.bf16.mxu1 %v1047_v23 }
  0x66   :  { %970 = vmatmul.mubr.bf16.vlgmr.msra.gmra.mrb[0].mxu0 %v1033_v14  ;;  %1000 = vmatpush3.bf16.msra.mxu1 %v1047_v23 }
  0x67   :  { %973 = vmatprep.mubr.bf16.mxu0 %v1034_v15 }
  0x6e   :  { %974 = vmatmul.mubr.bf16.gmra.mrb[4].mxu0 %v1035_v18  ;;  %v1346_v18 = vstv %s73_s2 }
  0x6f   :  { %977 = vmatprep.mubr.bf16.mxu0 %v1036_v19 }
  0x76   :  { %978 = vmatmul.mubr.bf16.gmra.mrb[8].mxu0 %v1037_v20 }
  0x77   :  { %981 = vmatprep.mubr.bf16.mxu0 %v1038_v21 }
  0x7e   :  { %982 = vmatmul.mubr.bf16.gmra.mrb[12].mxu0 %v1039_v22 }
 0x139   :  { %v971_v24 = vpop.f32.mrb[0].mxu0 }
 0x13a   :  { %v237_v25 = vpop.f32.mrb[1].mxu0  ;;  %v302_v26 = vmul.f32 %v971_v24, %v971_v24 }
 0x13b   :  { %v972_v27 = vpop.f32.mrb[2].mxu0  ;;  %v300_v28 = vmul.f32 %v237_v25, %v237_v25 }
 0x13c   :  { %v397_v29 = vpack.c.bf16 %v972_v27, %v971_v24  ;;  %320 = vadd.xlane.f32.xlu1 %v302_v26  ;;  %v240_v30 = vpop.f32.mrb[3].mxu0  ;;  %v303_v32 = vmul.f32 %v972_v27, %v972_v27 }
 0x13d   :  { %316 = vadd.xlane.f32.xlu0 %v300_v28  ;;  %v396_v31 = vpack.c.bf16 %v240_v30, %v237_v25  ;;  %v301_v33 = vmul.f32 %v240_v30, %v240_v30 }
 0x13f   :  { %1001 = vmatprep.mubr.bf16.mxu1 %v396_v31 }
 0x140   :  { %322 = vadd.xlane.f32.xlu1 %v303_v32  ;;  %1002 = vmatmul.mubr.bf16.vlgmr.msra.gmra.mrb[0].mxu1 %v397_v29 }
 0x141   :  { %318 = vadd.xlane.f32.xlu0 %v301_v33  ;;  %v975_v34 = vpop.f32.mrb[4].mxu0 }
 0x142   :  { %v253_v35 = vpop.f32.mrb[5].mxu0  ;;  %v306_v36 = vmul.f32 %v975_v34, %v975_v34 }
 0x143   :  { %v976_v37 = vpop.f32.mrb[6].mxu0  ;;  %v304_v42 = vmul.f32 %v253_v35, %v253_v35 }
 0x144   :  { %v399_v38 = vpack.c.bf16 %v976_v37, %v975_v34  ;;  %v256_v39 = vpop.f32.mrb[7].mxu0  ;;  %v307_v40 = vmul.f32 %v976_v37, %v976_v37 }
 0x145   :  { %v398_v41 = vpack.c.bf16 %v256_v39, %v253_v35  ;;  %328 = vadd.xlane.f32.xlu0 %v306_v36  ;;  %v305_v43 = vmul.f32 %v256_v39, %v256_v39 }
 0x146   :  { %330 = vadd.xlane.f32.xlu1 %v307_v40 }
 0x147   :  { %1005 = vmatprep.mubr.bf16.mxu1 %v398_v41 }
 0x148   :  { %1006 = vmatmul.mubr.bf16.gmra.mrb[4].mxu1 %v399_v38 }
 0x149   :  { %324 = vadd.xlane.f32.xlu0 %v304_v42  ;;  %v979_v44 = vpop.f32.mrb[8].mxu0 }
 0x14a   :  { %326 = vadd.xlane.f32.xlu1 %v305_v43  ;;  %v269_v45 = vpop.f32.mrb[9].mxu0  ;;  %v310_v46 = vmul.f32 %v979_v44, %v979_v44 }
 0x14b   :  { %v980_v47 = vpop.f32.mrb[10].mxu0  ;;  %v308_v52 = vmul.f32 %v269_v45, %v269_v45 }
 0x14c   :  { %v401_v48 = vpack.c.bf16 %v980_v47, %v979_v44  ;;  %v272_v49 = vpop.f32.mrb[11].mxu0  ;;  %v311_v50 = vmul.f32 %v980_v47, %v980_v47 }
 0x14d   :  { %v400_v51 = vpack.c.bf16 %v272_v49, %v269_v45  ;;  %336 = vadd.xlane.f32.xlu0 %v310_v46  ;;  %v309_v53 = vmul.f32 %v272_v49, %v272_v49 }
 0x14e   :  { %338 = vadd.xlane.f32.xlu1 %v311_v50 }
 0x14f   :  { %1009 = vmatprep.mubr.bf16.mxu1 %v400_v51 }
 0x150   :  { %1010 = vmatmul.mubr.bf16.gmra.mrb[8].mxu1 %v401_v48 }
 0x151   :  { %332 = vadd.xlane.f32.xlu0 %v308_v52  ;;  %v983_v54 = vpop.f32.mrb[12].mxu0 }
 0x152   :  { %334 = vadd.xlane.f32.xlu1 %v309_v53  ;;  %v285_v55 = vpop.f32.mrb[13].mxu0  ;;  %v314_v62 = vmul.f32 %v983_v54, %v983_v54 }
 0x153   :  { %v984_v56 = vpop.f32.mrb[14].mxu0  ;;  %v312_v57 = vmul.f32 %v285_v55, %v285_v55 }
 0x154   :  { %v403_v58 = vpack.c.bf16 %v984_v56, %v983_v54  ;;  %v288_v59 = vpop.f32.mrb[15].mxu0  ;;  %v315_v63 = vmul.f32 %v984_v56, %v984_v56 }
 0x155   :  { %v313_v60 = vmul.f32 %v288_v59, %v288_v59  ;;  %v402_v61 = vpack.c.bf16 %v288_v59, %v285_v55  ;;  %340 = vadd.xlane.f32.xlu0 %v312_v57 }
 0x157   :  { %1013 = vmatprep.mubr.bf16.mxu1 %v402_v61  ;;  %342 = vadd.xlane.f32.xlu1 %v313_v60 }
 0x158   :  { %1014 = vmatmul.mubr.bf16.gmra.mrb[12].mxu1 %v403_v58 }
 0x159   :  { %344 = vadd.xlane.f32.xlu0 %v314_v62 }
 0x15b   :  { %346 = vadd.xlane.f32.xlu1 %v315_v63 }
 0x1c9   :  { %v321_v1 = vpop.xlane.xlu1 %320 }
 0x1ca   :  { %v317_v0 = vpop.xlane.xlu0 %316  ;;  %1048 = vrsqrt.f32 %v321_v1  ;;  %vm350_vm0 = vcmp.gt.f32.partialorder %v321_v1, 0.0 }
 0x1cb   :  { %1050 = vrsqrt.f32 %v317_v0  ;;  %vm348_vm1 = vcmp.gt.f32.partialorder %v317_v0, 0.0 }
 0x1cd   :  { %v323_v3 = vpop.xlane.xlu1 %322 }
 0x1ce   :  { %v319_v2 = vpop.xlane.xlu0 %318  ;;  %1052 = vrsqrt.f32 %v323_v3  ;;  %vm351_vm2 = vcmp.gt.f32.partialorder %v323_v3, 0.0 }
 0x1cf   :  { %1054 = vrsqrt.f32 %v319_v2  ;;  %vm349_vm3 = vcmp.gt.f32.partialorder %v319_v2, 0.0 }
 0x1d2   :  { %v329_v4 = vpop.xlane.xlu0 %328 }
 0x1d3   :  { %v1323_v5 = vpop.xlane.xlu1 %330  ;;  %1056 = vrsqrt.f32 %v329_v4  ;;  %vm354_vm4 = vcmp.gt.f32.partialorder %v329_v4, 0.0 }
 0x1d4   :  { %1058 = vrsqrt.f32 %v1323_v5  ;;  %v1049_v12 = vpop.eup %1048  ;;  %vm355_vm5 = vcmp.gt.f32.partialorder %v1323_v5, 0.0 }
 0x1d5   :  { %v1051_v13 = vpop.eup %1050  ;;  %v382_v19 = vsel %vm350_vm0, %v1049_v12, 0.0  ;;  %vm863_vm0 = vcmask 1041409  }
 0x1d6   :  { %v1325_v6 = vpop.xlane.xlu0 %324  ;;  %v380_v21 = vsel %vm348_vm1, %v1051_v13, 0.0  ;;  %v568_v28 = vmul.f32 %v1346_v18, %v382_v19  ;;  %vm865_vm1 = vcmask 1042434  }
 0x1d7   :  { %v1327_v7 = vpop.xlane.xlu1 %326  ;;  %1060 = vrsqrt.f32 %v1325_v6  ;;  %v566_v32 = vmul.f32 %v1346_v18, %v380_v21  ;;  %vm352_vm6 = vcmp.gt.f32.partialorder %v1325_v6, 0.0 }
 0x1d8   :  { %1062 = vrsqrt.f32 %v1327_v7  ;;  %v1053_v15 = vpop.eup %1052  ;;  %vm353_vm7 = vcmp.gt.f32.partialorder %v1327_v7, 0.0 }
 0x1d9   :  { %v1055_v17 = vpop.eup %1054  ;;  %v383_v20 = vsel %vm351_vm2, %v1053_v15, 0.0  ;;  %vm867_vm2 = vcmask 1043459  }
 0x1da   :  { %v1329_v8 = vpop.xlane.xlu0 %336  ;;  %v381_v22 = vsel %vm349_vm3, %v1055_v17, 0.0  ;;  %v569_v30 = vmul.f32 %v1346_v18, %v383_v20  ;;  %vm869_vm3 = vcmask 1044484  }
 0x1db   :  { %v1331_v9 = vpop.xlane.xlu1 %338  ;;  %1064 = vrsqrt.f32 %v1329_v8  ;;  %v567_v34 = vmul.f32 %v1346_v18, %v381_v22  ;;  %vm358_vm8 = vcmp.gt.f32.partialorder %v1329_v8, 0.0 }
 0x1dc   :  { %1066 = vrsqrt.f32 %v1331_v9  ;;  %vm359_vm9 = vcmp.gt.f32.partialorder %v1331_v9, 0.0 }
 0x1dd   :  { %v1057_v23 = vpop.eup %1056 }
 0x1de   :  { %v1333_v10 = vpop.xlane.xlu0 %332  ;;  %v1059_v26 = vpop.eup %1058  ;;  %v386_v40 = vsel %vm354_vm4, %v1057_v23, 0.0  ;;  %vm871_vm4 = vcmask 1045509  }
 0x1df   :  { %v1335_v11 = vpop.xlane.xlu1 %334  ;;  %1068 = vrsqrt.f32 %v1333_v10  ;;  %v387_v43 = vsel %vm355_vm5, %v1059_v26, 0.0  ;;  %vm356_vm10 = vcmp.gt.f32.partialorder %v1333_v10, 0.0  ;;  %v572_v52 = vmul.f32 %v1346_v18, %v386_v40 }
 0x1e0   :  { %1070 = vrsqrt.f32 %v1335_v11  ;;  %vm357_vm11 = vcmp.gt.f32.partialorder %v1335_v11, 0.0  ;;  %v573_v56 = vmul.f32 %v1346_v18, %v387_v43  ;;  %vm873_vm5 = vcmask 1046534  }
 0x1e1   :  { %v1061_v31 = vpop.eup %1060 }
 0x1e2   :  { %v1341_v14 = vpop.xlane.xlu0 %340  ;;  %v1063_v35 = vpop.eup %1062  ;;  %v384_v46 = vsel %vm352_vm6, %v1061_v31, 0.0  ;;  %vm875_vm6 = vcmask 1047559  }
 0x1e3   :  { %1072 = vrsqrt.f32 %v1341_v14  ;;  %v385_v47 = vsel %vm353_vm7, %v1063_v35, 0.0  ;;  %vm360_vm12 = vcmp.gt.f32.partialorder %v1341_v14, 0.0  ;;  %v570_v60 = vmul.f32 %v1346_v18, %v384_v46 }
 0x1e4   :  { %v1343_v16 = vpop.xlane.xlu1 %342  ;;  %v571_v61 = vmul.f32 %v1346_v18, %v385_v47 }
 0x1e5   :  { %1074 = vrsqrt.f32 %v1343_v16  ;;  %v1065_v39 = vpop.eup %1064  ;;  %vm361_vm13 = vcmp.gt.f32.partialorder %v1343_v16, 0.0 }
 0x1e6   :  { %v1352_v24 = vpop.xlane.xlu0 %344  ;;  %v1067_v45 = vpop.eup %1066  ;;  %v390_v50 = vsel %vm358_vm8, %v1065_v39, 0.0 }
 0x1e7   :  { %1076 = vrsqrt.f32 %v1352_v24  ;;  %v391_v63 = vsel %vm359_vm9, %v1067_v45, 0.0  ;;  %vm362_vm14 = vcmp.gt.f32.partialorder %v1352_v24, 0.0  ;;  %v576_v2 = vmul.f32 %v1346_v18, %v390_v50 }
 0x1e8   :  { %v1354_v27 = vpop.xlane.xlu1 %346  ;;  %v577_v23 = vmul.f32 %v1346_v18, %v391_v63 }
 0x1e9   :  { %1078 = vrsqrt.f32 %v1354_v27  ;;  %v1069_v49 = vpop.eup %1068  ;;  %vm363_vm15 = vcmp.gt.f32.partialorder %v1354_v27, 0.0 }
 0x1ea   :  { %v1071_v53 = vpop.eup %1070  ;;  %v388_v3 = vsel %vm356_vm10, %v1069_v49, 0.0 }
 0x1eb   :  { %v389_v8 = vsel %vm357_vm11, %v1071_v53, 0.0  ;;  %v574_v14 = vmul.f32 %v1346_v18, %v388_v3 }
 0x1ec   :  { %v575_v16 = vmul.f32 %v1346_v18, %v389_v8 }
 0x1ed   :  { %v1073_v57 = vpop.eup %1072 }
 0x1ee   :  { %v392_v17 = vsel %vm360_vm12, %v1073_v57, 0.0 }
 0x1ef   :  { %v1075_v62 = vpop.eup %1074  ;;  %v578_v31 = vmul.f32 %v1346_v18, %v392_v17 }
 0x1f0   :  { %v393_v10 = vsel %vm361_vm13, %v1075_v62, 0.0 }
 0x1f1   :  { %v1077_v15 = vpop.eup %1076 }
 0x1f2   :  { %v394_v27 = vsel %vm362_vm14, %v1077_v15, 0.0 }
 0x1f3   :  { %v1079_v21 = vpop.eup %1078 }
 0x213   :  { %v1003_v25 = vpop.f32.mrb[0].mxu1 }
 0x214   :  { %v502_v29 = vpop.f32.mrb[1].mxu1  ;;  %v1363_v36 = vmul.f32 %v1003_v25, %v568_v28 }
 0x215   :  { %v1004_v33 = vpop.f32.mrb[2].mxu1  ;;  %v1368_v41 = vmul.f32 %v566_v32, %v502_v29  ;;  %v579_v32 = vmul.f32 %v1346_v18, %v393_v10 }
 0x216   :  { %v1365_v37 = vmul.f32 %v1004_v33, %v569_v30  ;;  %v505_v38 = vpop.f32.mrb[3].mxu1  ;;  %v395_v33 = vsel %vm363_vm15, %v1079_v21, 0.0 }
 0x217   :  { %v1370_v42 = vmul.f32 %v567_v34, %v505_v38 }
 0x218   :  { %v605_v44 = vmax.f32 %v1363_v36, %v1365_v37 }
 0x219   :  { %v598_v48 = vmax.f32 %v1368_v41, %v1370_v42 }
 0x21a   :  { %v606_v51 = vrot.slane %v605_v44, 4 }
 0x21b   :  { %v599_v54 = vrot.slane %v598_v48, 4  ;;  %v1007_v55 = vpop.f32.mrb[4].mxu1 }
 0x21c   :  { %v607_v58 = vmax.f32 %v605_v44, %v606_v51  ;;  %v518_v59 = vpop.f32.mrb[5].mxu1  ;;  %v1393_v5 = vmul.f32 %v1007_v55, %v572_v52 }
 0x21d   :  { %v600_v0 = vmax.f32 %v598_v48, %v599_v54  ;;  %v1008_v1 = vpop.f32.mrb[6].mxu1  ;;  %v1399_v12 = vmul.f32 %v570_v60, %v518_v59 }
 0x21e   :  { %v608_v4 = vrot.slane %v607_v58, 2  ;;  %v1395_v6 = vmul.f32 %v1008_v1, %v573_v56  ;;  %v521_v7 = vpop.f32.mrb[7].mxu1 }
 0x21f   :  { %v601_v9 = vrot.slane %v600_v0, 2  ;;  %v1401_v13 = vmul.f32 %v571_v61, %v521_v7 }
 0x220   :  { %v609_v19 = vmax.f32 %v607_v58, %v608_v4  ;;  %v619_v20 = vmax.f32 %v1393_v5, %v1395_v6  ;;  %v581_v4 = vmul.f32 %v1346_v18, %v395_v33 }
 0x221   :  { %v602_v11 = vmax.f32 %v600_v0, %v601_v9  ;;  %v612_v22 = vmax.f32 %v1399_v12, %v1401_v13  ;;  %v580_v0 = vmul.f32 %v1346_v18, %v394_v27 }
 0x222   :  { %v610_v25 = vrot.slane %v609_v19, 1  ;;  %v620_v26 = vrot.slane %v619_v20, 4 }
 0x223   :  { %v603_v28 = vrot.slane %v602_v11, 1  ;;  %v613_v29 = vrot.slane %v612_v22, 4  ;;  %v1011_v30 = vpop.f32.mrb[8].mxu1 }
 0x224   :  { %v611_v34 = vmax.f32 %v609_v19, %v610_v25  ;;  %v621_v35 = vmax.f32 %v619_v20, %v620_v26  ;;  %v534_v38 = vpop.f32.mrb[9].mxu1  ;;  %v1419_v43 = vmul.f32 %v1011_v30, %v576_v2 }
 0x225   :  { %v604_v39 = vmax.f32 %v602_v11, %v603_v28  ;;  %v614_v40 = vmax.f32 %v612_v22, %v613_v29  ;;  %v1421_v44 = vmul.f32 %v574_v14, %v534_v38  ;;  %v1012_v45 = vpop.f32.mrb[10].mxu1 }
 0x226   :  { %v656_v46 = vsub.f32 %v1363_v36, %v611_v34  ;;  %v657_v47 = vsub.f32 %v1365_v37, %v611_v34  ;;  %v622_v48 = vrot.slane %v621_v35, 2  ;;  %v1425_v49 = vmul.f32 %v1012_v45, %v577_v23  ;;  %v537_v24 = vpop.f32.mrb[11].mxu1 }
 0x227   :  { %v654_v50 = vsub.f32 %v1368_v41, %v604_v39  ;;  %v655_v51 = vsub.f32 %v1370_v42, %v604_v39  ;;  %v615_v52 = vrot.slane %v614_v40, 2  ;;  %v1429_v53 = vmul.f32 %v575_v16, %v537_v24 }
 0x228   :  { %v674_v54 = vmul.f32 1.442695, %v656_v46  ;;  %v676_v55 = vmul.f32 1.442695, %v657_v47  ;;  %v623_v56 = vmax.f32 %v621_v35, %v622_v48  ;;  %v633_v57 = vmax.f32 %v1419_v43, %v1425_v49 }
 0x229   :  { %v670_v58 = vmul.f32 1.442695, %v654_v50  ;;  %v672_v59 = vmul.f32 1.442695, %v655_v51  ;;  %v616_v60 = vmax.f32 %v614_v40, %v615_v52  ;;  %v626_v61 = vmax.f32 %v1421_v44, %v1429_v53 }
 0x22a   :  { %1080 = vpow2.f32 %v674_v54  ;;  %v624_v62 = vrot.slane %v623_v56, 1  ;;  %v634_v63 = vrot.slane %v633_v57, 4 }
 0x22b   :  { %1082 = vpow2.f32 %v676_v55  ;;  %v617_v1 = vrot.slane %v616_v60, 1  ;;  %v627_v2 = vrot.slane %v626_v61, 4  ;;  %v1015_v3 = vpop.f32.mrb[12].mxu1 }
 0x22c   :  { %1084 = vpow2.f32 %v670_v58  ;;  %v625_v7 = vmax.f32 %v623_v56, %v624_v62  ;;  %v635_v8 = vmax.f32 %v633_v57, %v634_v63  ;;  %v1437_v9 = vmul.f32 %v1015_v3, %v580_v0  ;;  %v550_v15 = vpop.f32.mrb[13].mxu1 }
 0x22d   :  { %1086 = vpow2.f32 %v672_v59  ;;  %v618_v17 = vmax.f32 %v616_v60, %v617_v1  ;;  %v628_v10 = vmax.f32 %v626_v61, %v627_v2  ;;  %v1439_v19 = vmul.f32 %v578_v31, %v550_v15  ;;  %v1016_v20 = vpop.f32.mrb[14].mxu1 }
 0x22e   :  { %v660_v21 = vsub.f32 %v1393_v5, %v625_v7  ;;  %v661_v11 = vsub.f32 %v1395_v6, %v625_v7  ;;  %v636_v22 = vrot.slane %v635_v8, 2  ;;  %v1443_v23 = vmul.f32 %v1016_v20, %v581_v4  ;;  %v553_v18 = vpop.f32.mrb[15].mxu1 }
 0x22f   :  { %v658_v25 = vsub.f32 %v1399_v12, %v618_v17  ;;  %v659_v26 = vsub.f32 %v1401_v13, %v618_v17  ;;  %v629_v14 = vrot.slane %v628_v10, 2  ;;  %v1447_v16 = vmul.f32 %v579_v32, %v553_v18 }
 0x230   :  { %v682_v28 = vmul.f32 1.442695, %v660_v21  ;;  %v684_v29 = vmul.f32 1.442695, %v661_v11  ;;  %v637_v30 = vmax.f32 %v635_v8, %v636_v22  ;;  %v647_v31 = vmax.f32 %v1437_v9, %v1443_v23 }
 0x231   :  { %v678_v27 = vmul.f32 1.442695, %v658_v25  ;;  %v680_v33 = vmul.f32 1.442695, %v659_v26  ;;  %v630_v34 = vmax.f32 %v628_v10, %v629_v14  ;;  %v640_v35 = vmax.f32 %v1439_v19, %v1447_v16 }
 0x232   :  { %1088 = vpow2.f32 %v682_v28  ;;  %v638_v38 = vrot.slane %v637_v30, 1  ;;  %v648_v39 = vrot.slane %v647_v31, 4 }
 0x233   :  { %1090 = vpow2.f32 %v684_v29  ;;  %v631_v40 = vrot.slane %v630_v34, 1  ;;  %v641_v50 = vrot.slane %v640_v35, 4 }
 0x234   :  { %v1081_v45 = vpop.eup %1080  ;;  %1092 = vpow2.f32 %v678_v27  ;;  %v639_v32 = vmax.f32 %v637_v30, %v638_v38  ;;  %v649_v46 = vmax.f32 %v647_v31, %v648_v39 }
 0x235   :  { %v1083_v47 = vpop.eup %1082  ;;  %v704_v48 = vmul.f32 %v1081_v45, %v1363_v36  ;;  %1094 = vpow2.f32 %v680_v33  ;;  %v1454_v24 = vmax.f32 %v630_v34, %v631_v40  ;;  %v642_v15 = vmax.f32 %v640_v35, %v641_v50 }
 0x236   :  { %v1085_v51 = vpop.eup %1084  ;;  %v705_v52 = vmul.f32 %v1083_v47, %v1365_v37  ;;  %v781_v54 = vadd.f32 %v1083_v47, %v1081_v45  ;;  %v664_v55 = vsub.f32 %v1419_v43, %v639_v32  ;;  %v665_v56 = vsub.f32 %v1425_v49, %v639_v32 }
 0x237   :  { %v1087_v57 = vpop.eup %1086  ;;  %v702_v58 = vmul.f32 %v1085_v51, %v1368_v41  ;;  %v662_v59 = vsub.f32 %v1421_v44, %v1454_v24  ;;  %v663_v36 = vsub.f32 %v1429_v53, %v1454_v24  ;;  %v650_v60 = vrot.slane %v649_v46, 2 }
 0x238   :  { %v725_v61 = vadd.f32 %v705_v52, %v704_v48  ;;  %v782_v62 = vrot.slane %v781_v54, 4  ;;  %v703_v63 = vmul.f32 %v1087_v57, %v1370_v42  ;;  %v774_v37 = vadd.f32 %v1087_v57, %v1085_v51 }
 0x239   :  { %v690_v0 = vmul.f32 1.442695, %v664_v55  ;;  %v692_v1 = vmul.f32 1.442695, %v665_v56  ;;  %v651_v2 = vmax.f32 %v649_v46, %v650_v60  ;;  %v686_v41 = vmul.f32 1.442695, %v662_v59 }
 0x23a   :  { %v726_v3 = vrot.slane %v725_v61, 4  ;;  %v783_v4 = vadd.f32 %v782_v62, %v781_v54  ;;  %v718_v7 = vadd.f32 %v703_v63, %v702_v58  ;;  %v775_v8 = vrot.slane %v774_v37, 4 }
 0x23b   :  { %1096 = vpow2.f32 %v690_v0  ;;  %v652_v28 = vrot.slane %v651_v2, 1  ;;  %v643_v38 = vrot.slane %v642_v15, 2  ;;  %v688_v54 = vmul.f32 1.442695, %v663_v36 }
 0x23c   :  { %v1089_v17 = vpop.eup %1088  ;;  %v727_v10 = vadd.f32 %v726_v3, %v725_v61  ;;  %v784_v20 = vrot.slane %v783_v4, 2  ;;  %v719_v21 = vrot.slane %v718_v7, 4  ;;  %v776_v11 = vadd.f32 %v775_v8, %v774_v37 }
 0x23d   :  { %v1091_v22 = vpop.eup %1090  ;;  %v708_v18 = vmul.f32 %v1089_v17, %v1393_v5  ;;  %1098 = vpow2.f32 %v692_v1  ;;  %v653_v48 = vmax.f32 %v651_v2, %v652_v28  ;;  %v644_v61 = vmax.f32 %v642_v15, %v643_v38 }
 0x23e   :  { %v1093_v42 = vpop.eup %1092  ;;  %v785_v25 = vadd.f32 %v784_v20, %v783_v4  ;;  %v720_v26 = vadd.f32 %v719_v21, %v718_v7  ;;  %v777_v14 = vrot.slane %v776_v11, 2  ;;  %v709_v30 = vmul.f32 %v1091_v22, %v1395_v6 }
 0x23f   :  { %v1095_v29 = vpop.eup %1094  ;;  %v795_v31 = vadd.f32 %v1091_v22, %v1089_v17  ;;  %v706_v27 = vmul.f32 %v1093_v42, %v1399_v12  ;;  %1100 = vpow2.f32 %v686_v41  ;;  %v728_v33 = vrot.slane %v727_v10, 2 }
 0x240   :  { %v786_v34 = vrot.slane %v785_v25, 1  ;;  %v778_v35 = vadd.f32 %v777_v14, %v776_v11  ;;  %v739_v39 = vadd.f32 %v709_v30, %v708_v18  ;;  %v707_v5 = vmul.f32 %v1095_v29, %v1401_v13 }
 0x241   :  { %v796_v40 = vrot.slane %v795_v31, 4  ;;  %v788_v45 = vadd.f32 %v1095_v29, %v1093_v42  ;;  %v721_v46 = vrot.slane %v720_v26, 2  ;;  %v729_v51 = vadd.f32 %v728_v33, %v727_v10 }
 0x242   :  { %v787_v32 = vadd.f32 %v786_v34, %v785_v25  ;;  %v779_v47 = vrot.slane %v778_v35, 1  ;;  %v740_v6 = vrot.slane %v739_v39, 4  ;;  %v732_v50 = vadd.f32 %v707_v5, %v706_v27 }
 0x243   :  { %v797_v24 = vadd.f32 %v796_v40, %v795_v31  ;;  %v789_v12 = vrot.slane %v788_v45, 4  ;;  %v668_v60 = vsub.f32 %v1437_v9, %v653_v48  ;;  %v722_v63 = vadd.f32 %v721_v46, %v720_v26 }
 0x244   :  { %1102 = vrcp.f32 %v787_v32  ;;  %v780_v52 = vadd.f32 %v779_v47, %v778_v35  ;;  %v741_v56 = vadd.f32 %v740_v6, %v739_v39  ;;  %v733_v58 = vrot.slane %v732_v50, 4 }
 0x245   :  { %v1097_v55 = vpop.eup %1096  ;;  %v798_v57 = vrot.slane %v797_v24, 2  ;;  %v790_v13 = vadd.f32 %v789_v12, %v788_v45  ;;  %v669_v3 = vsub.f32 %v1443_v23, %v653_v48  ;;  %v730_v7 = vrot.slane %v729_v51, 1 }
 0x246   :  { %1104 = vrcp.f32 %v780_v52  ;;  %v712_v59 = vmul.f32 %v1097_v55, %v1419_v43  ;;  %v734_v0 = vadd.f32 %v733_v58, %v732_v50  ;;  %v742_v8 = vrot.slane %v741_v56, 2 }
 0x247   :  { %v1099_v62 = vpop.eup %1098  ;;  %v799_v37 = vadd.f32 %v798_v57, %v797_v24  ;;  %v791_v1 = vrot.slane %v790_v13, 2  ;;  %1106 = vpow2.f32 %v688_v54  ;;  %v698_v20 = vmul.f32 1.442695, %v668_v60 }
 0x248   :  { %v713_v2 = vmul.f32 %v1099_v62, %v1425_v49  ;;  %v809_v36 = vadd.f32 %v1099_v62, %v1097_v55  ;;  %v1477_v21 = vstv %s1469_s27  ;;  %v723_v11 = vrot.slane %v722_v63, 1 }
 0x249   :  { %v1101_v4 = vpop.eup %1100  ;;  %v800_v41 = vrot.slane %v799_v37, 1  ;;  %v792_v43 = vadd.f32 %v791_v1, %v790_v13  ;;  %v735_v49 = vrot.slane %v734_v0, 2  ;;  %1108 = vpow2.f32 %v698_v20 }
 0x24a   :  { %v753_v17 = vadd.f32 %v713_v2, %v712_v59  ;;  %v810_v10 = vrot.slane %v809_v36, 4  ;;  %v710_v15 = vmul.f32 %v1101_v4, %v1421_v44  ;;  %v700_v25 = vmul.f32 1.442695, %v669_v3 }
 0x24b   :  { %v801_v22 = vadd.f32 %v800_v41, %v799_v37  ;;  %v793_v18 = vrot.slane %v792_v43, 1  ;;  %v731_v26 = vadd.f32 %v730_v7, %v729_v51  ;;  %v743_v30 = vadd.f32 %v742_v8, %v741_v56 }
 0x24c   :  { %v811_v42 = vadd.f32 %v810_v10, %v809_v36  ;;  %v754_v28 = vrot.slane %v753_v17, 4  ;;  %v645_v27 = vrot.slane %v644_v61, 1  ;;  %v724_v33 = vadd.f32 %v723_v11, %v722_v63 }
 0x24d   :  { %1110 = vrcp.f32 %v801_v22  ;;  %v794_v14 = vadd.f32 %v793_v18, %v792_v43  ;;  %v736_v35 = vadd.f32 %v735_v49, %v734_v0  ;;  %v744_v46 = vrot.slane %v743_v30, 1 }
 0x24e   :  { %v1103_v29 = vpop.eup %1102  ;;  %v812_v31 = vrot.slane %v811_v42, 2  ;;  %1112 = vpow2.f32 %v700_v25  ;;  %v646_v39 = vmax.f32 %v644_v61, %v645_v27  ;;  %v755_v45 = vadd.f32 %v754_v28, %v753_v17 }
 0x24f   :  { %v839_v44 = vmul.f32 %v1103_v29, %v731_v26  ;;  %1114 = vrcp.f32 %v794_v14  ;;  %v737_v51 = vrot.slane %v736_v35, 1  ;;  %v745_v60 = vadd.f32 %v744_v46, %v743_v30 }
 0x250   :  { %v1105_v34 = vpop.eup %1104  ;;  %v813_v38 = vadd.f32 %v812_v31, %v811_v42  ;;  %v666_v48 = vsub.f32 %v1439_v19, %v646_v39  ;;  %v667_v6 = vsub.f32 %v1447_v16, %v646_v39  ;;  %v756_v56 = vrot.slane %v755_v45, 2 }
 0x251   :  { %v848_v40 = vmul.f32 %v1477_v21, %v839_v44  ;;  %v838_v5 = vmul.f32 %v1105_v34, %v724_v33  ;;  %v1107_v32 = vpop.eup %1106  ;;  %v738_v1 = vadd.f32 %v737_v51, %v736_v35 }
 0x252   :  { %v814_v47 = vrot.slane %v813_v38, 1  ;;  %v711_v50 = vmul.f32 %v1107_v32, %v1429_v53  ;;  %v802_v12 = vadd.f32 %v1107_v32, %v1101_v4  ;;  %v694_v54 = vmul.f32 1.442695, %v666_v48 }
 0x253   :  { %v847_v24 = vmul.f32 %v1477_v21, %v838_v5  ;;  %v696_v55 = vmul.f32 1.442695, %v667_v6  ;;  %v1109_v59 = vpop.eup %1108  ;;  %v757_v36 = vadd.f32 %v756_v56, %v755_v45 }
 0x254   :  { %v815_v52 = vadd.f32 %v814_v47, %v813_v38  ;;  %v746_v57 = vadd.f32 %v711_v50, %v710_v15  ;;  %v803_v58 = vrot.slane %v802_v12, 4  ;;  %1116 = vpow2.f32 %v694_v54 }
 0x255   :  { %v864_v13 = vsel %vm863_vm0, %v848_v40, %v847_v24  ;;  %v716_v37 = vmul.f32 %v1109_v59, %v1437_v9  ;;  %1118 = vpow2.f32 %v696_v55  ;;  %v758_v9 = vrot.slane %v757_v36, 1 }
 0x256   :  { %v747_v62 = vrot.slane %v746_v57, 4  ;;  %v804_v63 = vadd.f32 %v803_v58, %v802_v12  ;;  %1120 = vrcp.f32 %v815_v52 }
 0x257   :  { %v1111_v61 = vpop.eup %1110  ;;  %v759_v29 = vadd.f32 %v758_v9, %v757_v36 }
 0x258   :  { %v1113_v53 = vpop.eup %1112  ;;  %v841_v0 = vmul.f32 %v1111_v61, %v745_v60  ;;  %v805_v3 = vrot.slane %v804_v63, 2  ;;  %v748_v41 = vadd.f32 %v747_v62, %v746_v57 }
 0x259   :  { %v1115_v2 = vpop.eup %1114  ;;  %v717_v4 = vmul.f32 %v1113_v53, %v1443_v23  ;;  %v823_v7 = vadd.f32 %v1113_v53, %v1109_v59 }
 0x25a   :  { %v840_v8 = vmul.f32 %v1115_v2, %v738_v1  ;;  %v806_v43 = vadd.f32 %v805_v3, %v804_v63  ;;  %v749_v18 = vrot.slane %v748_v41, 2  ;;  %v850_v49 = vmul.f32 %v1477_v21, %v841_v0 }
 0x25b   :  { %v767_v17 = vadd.f32 %v717_v4, %v716_v37  ;;  %v824_v10 = vrot.slane %v823_v7, 4 }
 0x25c   :  { %v849_v15 = vmul.f32 %v1477_v21, %v840_v8  ;;  %v807_v20 = vrot.slane %v806_v43, 1  ;;  %v750_v44 = vadd.f32 %v749_v18, %v748_v41 }
 0x25d   :  { %v768_v11 = vrot.slane %v767_v17, 4  ;;  %v825_v22 = vadd.f32 %v824_v10, %v823_v7 }
 0x25e   :  { %v866_v42 = vsel %vm865_vm1, %v849_v15, %v864_v13  ;;  %v808_v25 = vadd.f32 %v807_v20, %v806_v43  ;;  %v1117_v26 = vpop.eup %1116  ;;  %v751_v32 = vrot.slane %v750_v44, 1 }
 0x25f   :  { %v826_v23 = vrot.slane %v825_v22, 2  ;;  %v868_v14 = vsel %vm867_vm2, %v850_v49, %v866_v42  ;;  %v1119_v28 = vpop.eup %1118  ;;  %v769_v30 = vadd.f32 %v768_v11, %v767_v17  ;;  %v714_v31 = vmul.f32 %v1117_v26, %v1439_v19 }
 0x260   :  { %1122 = vrcp.f32 %v808_v25  ;;  %v1121_v27 = vpop.eup %1120  ;;  %v715_v33 = vmul.f32 %v1119_v28, %v1447_v16  ;;  %v816_v34 = vadd.f32 %v1119_v28, %v1117_v26  ;;  %v752_v19 = vadd.f32 %v751_v32, %v750_v44 }
 0x261   :  { %v827_v35 = vadd.f32 %v826_v23, %v825_v22  ;;  %v843_v38 = vmul.f32 %v1121_v27, %v759_v29  ;;  %v770_v45 = vrot.slane %v769_v30, 2 }
 0x262   :  { %v760_v39 = vadd.f32 %v715_v33, %v714_v31  ;;  %v817_v40 = vrot.slane %v816_v34, 4 }
 0x263   :  { %v828_v5 = vrot.slane %v827_v35, 1  ;;  %v771_v24 = vadd.f32 %v770_v45, %v769_v30  ;;  %v852_v58 = vmul.f32 %v1477_v21, %v843_v38 }
 0x264   :  { %v761_v46 = vrot.slane %v760_v39, 4  ;;  %v818_v47 = vadd.f32 %v817_v40, %v816_v34 }
 0x265   :  { %v829_v48 = vadd.f32 %v828_v5, %v827_v35  ;;  %v772_v55 = vrot.slane %v771_v24, 1 }
 0x266   :  { %v819_v6 = vrot.slane %v818_v47, 2  ;;  %v762_v50 = vadd.f32 %v761_v46, %v760_v39 }
 0x267   :  { %1124 = vrcp.f32 %v829_v48  ;;  %v773_v60 = vadd.f32 %v772_v55, %v771_v24 }
 0x268   :  { %v820_v12 = vadd.f32 %v819_v6, %v818_v47  ;;  %v763_v54 = vrot.slane %v762_v50, 2 }
 0x26a   :  { %v1123_v51 = vpop.eup %1122  ;;  %v821_v52 = vrot.slane %v820_v12, 1  ;;  %v764_v59 = vadd.f32 %v763_v54, %v762_v50 }
 0x26b   :  { %v842_v16 = vmul.f32 %v1123_v51, %v752_v19 }
 0x26c   :  { %v822_v56 = vadd.f32 %v821_v52, %v820_v12  ;;  %v765_v37 = vrot.slane %v764_v59, 1 }
 0x26d   :  { %v851_v57 = vmul.f32 %v1477_v21, %v842_v16 }
 0x26e   :  { %1126 = vrcp.f32 %v822_v56  ;;  %v766_v53 = vadd.f32 %v765_v37, %v764_v59 }
 0x26f   :  { %v870_v13 = vsel %vm869_vm3, %v851_v57, %v868_v14 }
 0x270   :  { %v872_v61 = vsel %vm871_vm4, %v852_v58, %v870_v13 }
 0x271   :  { %v1125_v62 = vpop.eup %1124 }
 0x272   :  { %v845_v63 = vmul.f32 %v1125_v62, %v773_v60 }
 0x274   :  { %v854_v36 = vmul.f32 %v1477_v21, %v845_v63 }
 0x278   :  { %v1127_v0 = vpop.eup %1126 }
 0x279   :  { %v844_v1 = vmul.f32 %v1127_v0, %v766_v53 }
 0x27b   :  { %v853_v2 = vmul.f32 %v1477_v21, %v844_v1 }
 0x27d   :  { %v874_v3 = vsel %vm873_vm5, %v853_v2, %v872_v61 }
 0x27e   :  { %v876_v4 = vsel %vm875_vm6, %v854_v36, %v874_v3 }
 0x27f   :  { %878 = vst [vmem:[#allocation10] sm:$0xff] %v876_v4 }
 0x280   :  { %1217 = shalt.err (!%p1214_p5)
}
 0x281   :  { %s1218_s9 = scalar_lea.hbm %s1511_s4, 128 }
 0x282   :  { %p1219_p6 = scmp.ne.s32.totalorder %s1511_s4, %s1218_s9  ;;  %p1222_p7 = scmp.lt.u32.totalorder %s1218_s9, %s1511_s4 }
 0x284   :  { %p1224_p8 = pnand %p1222_p7, %p1219_p6 }
 0x286   :  { %1227 = shalt.err (!%p1224_p8)
}
 0x287   :  { %888 = dma.vmem_to_hbm [thread:$0]  %s886_s5, 128, %s1511_s4, [#allocation4]  }
 0x288   :  { %1234 = dma.done.wait [#allocation4], 128  }
 0x289   :  { %1235 = vsyncadd [#allocation4], 4294967168 }
 0x28a   :  { %892 = vsyncpa [#allocation3], 1 }
 0x28b   :  { %893 = vsyncpa [#allocation7], 1 }
 0x28c   :  { %894 = vsyncpa [#allocation4], 1 }
 0x28d   :  { %895 = vsyncpa [#allocation5], 1 }

// kernel: tpu_custom_call.1
= control target key start
LH: loop header
LB: loop body
LE: loop exit
PB: predicated region body
PF: predicated region fallthrough
CT: control target
= control target key end

     0   :  { %9 = vsyncpa [#allocation3], 0  ;;  %s1507_s0 = inlined_call_operand.hbm [shape: bf16[128,128], index: 0, kind: input, shape index: {}]   ;;  %s1508_s1 = inlined_call_operand.hbm [shape: bf16[128,128], index: 1, kind: input, shape index: {}]   ;;  %s1509_s2 = inlined_call_operand.hbm [shape: bf16[128,128], index: 2, kind: input, shape index: {}]   ;;  %s1510_s3 = inlined_call_operand.vmem [shape: f32[2], index: 3, kind: input, shape index: {}]   ;;  %s1511_s4 = inlined_call_operand.hbm [shape: f32[8,128], index: 4, kind: output, shape index: {}]  }
   0x1   :  { %10 = vsyncpa [#allocation7], 0 }
   0x2   :  { %11 = vsyncpa [#allocation5], 0 }
   0x3   :  { %12 = vsyncpa [#allocation4], 0  ;;  %s1236_s15 = smov [#allocation6]   ;;  %s1237_s17 = smov [#allocation2]  }
   0x4   :  { %s30_s16 = sshll.u32 %s1236_s15, 4  ;;  %s18_s18 = sshll.u32 %s1237_s17, 4  ;;  %s31_s16 = int_to_ptr.vmem [resolvable:$true] %s30_s16  ;;  %s1268_s18 = int_to_ptr.vmem [resolvable:$true] %s18_s18 }
   0x5   :  { %s1128_s21 = scalar_lea.hbm %s1508_s1, 1024 }
   0x6   :  { %p1129_p0 = scmp.ne.s32.totalorder %s1508_s1, %s1128_s21  ;;  %p1132_p1 = scmp.lt.u32.totalorder %s1128_s21, %s1508_s1 }
   0x8   :  { %p1134_p2 = pnand %p1132_p1, %p1129_p0 }
   0xa   :  { %1137 = shalt.err (!%p1134_p2)
}
   0xb   :  { %s1138_s26 = scalar_lea.vmem %s31_s16, 1024  ;;  %p1143_p4 = scmp.lt.s32.totalorder %s31_s16, %s31_s16 }
   0xc   :  { %p1139_p3 = scmp.ne.s32.totalorder %s31_s16, %s1138_s26  ;;  %p1144_p5 = scmp.lt.s32.totalorder %s1138_s26, %s1138_s26 }
   0xe   :  { %p1145_p6 = por %p1144_p5, %p1143_p4 }
  0x10   :  { %p1146_p7 = pnand %p1145_p6, %p1139_p3 }
  0x12   :  { %1149 = shalt.err (!%p1146_p7)
}
  0x13   :  { %s1238_s27 = smov 64   ;;  %s1239_s28 = smov 4  }
  0x14   :  { %36 = dma.hbm_to_vmem [thread:$0]  %s1508_s1, 1024, %s31_s16, [#allocation7], %s1238_s27, %s1238_s27, %s1239_s28  }
  0x15   :  { %s1150_s7 = scalar_lea.hbm %s1507_s0, 1024 }
  0x16   :  { %p1151_p8 = scmp.ne.s32.totalorder %s1507_s0, %s1150_s7  ;;  %p1154_p9 = scmp.lt.u32.totalorder %s1150_s7, %s1507_s0 }
  0x18   :  { %p1156_p10 = pnand %p1154_p9, %p1151_p8 }
  0x1a   :  { %1159 = shalt.err (!%p1156_p10)
}
  0x1b   :  { %s1160_s12 = scalar_lea.vmem %s1268_s18, 1024  ;;  %p1165_p12 = scmp.lt.s32.totalorder %s1268_s18, %s1268_s18 }
  0x1c   :  { %p1161_p11 = scmp.ne.s32.totalorder %s1268_s18, %s1160_s12  ;;  %p1166_p13 = scmp.lt.s32.totalorder %s1160_s12, %s1160_s12 }
  0x1e   :  { %p1167_p0 = por %p1166_p13, %p1165_p12 }
  0x20   :  { %p1168_p1 = pnand %p1167_p0, %p1161_p11 }
  0x22   :  { %1171 = shalt.err (!%p1168_p1)
}
  0x23   :  { %24 = dma.hbm_to_vmem [thread:$0]  %s1507_s0, 1024, %s1268_s18, [#allocation3], %s1238_s27, %s1238_s27, %s1239_s28  }
  0x24   :  { %s55_s16 = sshll.u32 %s1510_s3, 4  ;;  %s1240_s17 = smov [#allocation8]   ;;  %s56_s16 = int_to_ptr.vmem [resolvable:$true] %s55_s16 }
  0x25   :  { %s42_s19 = sshll.u32 %s1240_s17, 4  ;;  %s1172_s22 = scalar_lea.hbm %s1509_s2, 1024  ;;  %s43_s19 = int_to_ptr.vmem [resolvable:$true] %s42_s19 }
  0x26   :  { %p1173_p2 = scmp.ne.s32.totalorder %s1509_s2, %s1172_s22  ;;  %p1176_p3 = scmp.lt.u32.totalorder %s1172_s22, %s1509_s2 }
  0x28   :  { %p1178_p4 = pnand %p1176_p3, %p1173_p2 }
  0x2a   :  { %1181 = shalt.err (!%p1178_p4)
}
  0x2b   :  { %s1182_s0 = scalar_lea.vmem %s43_s19, 1024  ;;  %p1187_p6 = scmp.lt.s32.totalorder %s43_s19, %s43_s19 }
  0x2c   :  { %p1183_p5 = scmp.ne.s32.totalorder %s43_s19, %s1182_s0  ;;  %p1188_p7 = scmp.lt.s32.totalorder %s1182_s0, %s1182_s0 }
  0x2e   :  { %p1189_p8 = por %p1188_p7, %p1187_p6 }
  0x30   :  { %p1190_p9 = pnand %p1189_p8, %p1183_p5 }
  0x32   :  { %1193 = shalt.err (!%p1190_p9)
}
  0x33   :  { %48 = dma.hbm_to_vmem [thread:$0]  %s1509_s2, 1024, %s43_s19, [#allocation7], %s1238_s27, %s1238_s27, %s1239_s28  }
  0x34   :  { %s1194_s29 = scalar_lea.vmem %s56_s16, 16  ;;  %p1199_p11 = scmp.lt.s32.totalorder %s56_s16, %s56_s16 }
  0x35   :  { %p1195_p10 = scmp.ne.s32.totalorder %s56_s16, %s1194_s29  ;;  %p1200_p12 = scmp.lt.s32.totalorder %s1194_s29, %s1194_s29 }
  0x37   :  { %p1201_p13 = por %p1200_p12, %p1199_p11 }
  0x39   :  { %p1202_p0 = pnand %p1201_p13, %p1195_p10 }
  0x3b   :  { %1205 = shalt.err (!%p1202_p0)
}
  0x3c   :  { %s1241_s30 = smov [#allocation9]  }
  0x3d   :  { %58 = dma.vmem_to_smem %s56_s16, 16, %s1241_s30, [#allocation5]  }
  0x3e   :  { %1228 = dma.done.wait [#allocation3], 1024  }
  0x3f   :  { %1229 = vsyncadd [#allocation3], 4294966272 }
  0x40   :  { %1230 = dma.done.wait [#allocation7], 2048  }
  0x41   :  { %1231 = vsyncadd [#allocation7], 4294965248 }
  0x42   :  { %1232 = dma.done.wait [#allocation5], 16  }
  0x43   :  { %1233 = vsyncadd [#allocation5], 4294967280 }
  0x44   :  { %71 = sfence }
  0x45   :  { %v1024_v0 = vld [vmem:[#allocation6] sm:$0xff]   ;;  %v1025_v1 = vld [vmem:[#allocation6 + $0x8] sm:$0xff]   ;;  %v1026_v2 = vld [vmem:[#allocation6 + $0x10] sm:$0xff]   ;;  %s73_s2 = sld [smem:[#allocation9]]  ;;  %s1469_s27 = sld [smem:[#allocation9 + $0x1]] }
  0x46   :  { %953 = vmatprep.subr.bf16.mxu0 %v1024_v0  ;;  %v1027_v3 = vld [vmem:[#allocation6 + $0x18] sm:$0xff]   ;;  %v1032_v4 = vld [vmem:[#allocation2] sm:$0xff]   ;;  %v1029_v6 = vld [vmem:[#allocation6 + $0x28] sm:$0xff]   ;;  %s1242_s28 = smov [#allocation10]  }
  0x47   :  { %954 = vmatpush3.bf16.msra.mxu0 %v1024_v0  ;;  %969 = vmatprep.mubr.bf16.mxu0 %v1032_v4  ;;  %v1028_v5 = vld [vmem:[#allocation6 + $0x20] sm:$0xff]   ;;  %v1041_v8 = vld [vmem:[#allocation8 + $0x8] sm:$0xff]   ;;  %v1030_v9 = vld [vmem:[#allocation6 + $0x30] sm:$0xff]   ;;  %s885_s5 = sshll.u32 %s1242_s28, 4  ;;  %s886_s5 = int_to_ptr.vmem [resolvable:$true] %s885_s5 }
  0x48   :  { %955 = vmatprep.subr.bf16.mxu0 %v1025_v1  ;;  %v1040_v7 = vld [vmem:[#allocation8] sm:$0xff]   ;;  %v1042_v10 = vld [vmem:[#allocation8 + $0x10] sm:$0xff]   ;;  %v1031_v11 = vld [vmem:[#allocation6 + $0x38] sm:$0xff]   ;;  %s1206_s6 = scalar_lea.vmem %s886_s5, 128  ;;  %p1211_p2 = scmp.lt.s32.totalorder %s886_s5, %s886_s5 }
  0x49   :  { %985 = vmatprep.subr.bf16.mxu1 %v1040_v7  ;;  %v1043_v12 = vld [vmem:[#allocation8 + $0x18] sm:$0xff]   ;;  %v1044_v13 = vld [vmem:[#allocation8 + $0x20] sm:$0xff]   ;;  %v1033_v14 = vld [vmem:[#allocation2 + $0x8] sm:$0xff]   ;;  %p1207_p1 = scmp.ne.s32.totalorder %s886_s5, %s1206_s6  ;;  %p1212_p3 = scmp.lt.s32.totalorder %s1206_s6, %s1206_s6 }
  0x4a   :  { %986 = vmatpush3.bf16.msra.mxu1 %v1040_v7  ;;  %v1034_v15 = vld [vmem:[#allocation2 + $0x10] sm:$0xff]   ;;  %v1045_v16 = vld [vmem:[#allocation8 + $0x28] sm:$0xff]   ;;  %v1035_v18 = vld [vmem:[#allocation2 + $0x18] sm:$0xff]  }
  0x4b   :  { %956 = vmatpush3.bf16.msra.mxu0 %v1025_v1  ;;  %987 = vmatprep.subr.bf16.mxu1 %v1041_v8  ;;  %v1046_v17 = vld [vmem:[#allocation8 + $0x30] sm:$0xff]   ;;  %v1036_v19 = vld [vmem:[#allocation2 + $0x20] sm:$0xff]   ;;  %v1037_v20 = vld [vmem:[#allocation2 + $0x28] sm:$0xff]   ;;  %p1213_p4 = por %p1212_p3, %p1211_p2 }
  0x4c   :  { %957 = vmatprep.subr.bf16.mxu0 %v1026_v2  ;;  %v1038_v21 = vld [vmem:[#allocation2 + $0x30] sm:$0xff]   ;;  %v1039_v22 = vld [vmem:[#allocation2 + $0x38] sm:$0xff]  }
  0x4d   :  { %v1047_v23 = vld [vmem:[#allocation8 + $0x38] sm:$0xff]   ;;  %p1214_p5 = pnand %p1213_p4, %p1207_p1 }
  0x4e   :  { %988 = vmatpush3.bf16.msra.mxu1 %v1041_v8 }
  0x4f   :  { %958 = vmatpush3.bf16.msra.mxu0 %v1026_v2  ;;  %989 = vmatprep.subr.bf16.mxu1 %v1042_v10 }
  0x50   :  { %959 = vmatprep.subr.bf16.mxu0 %v1027_v3 }
  0x52   :  { %990 = vmatpush3.bf16.msra.mxu1 %v1042_v10 }
  0x53   :  { %960 = vmatpush3.bf16.msra.mxu0 %v1027_v3  ;;  %991 = vmatprep.subr.bf16.mxu1 %v1043_v12 }
  0x54   :  { %961 = vmatprep.subr.bf16.mxu0 %v1028_v5 }
  0x56   :  { %992 = vmatpush3.bf16.msra.mxu1 %v1043_v12 }
  0x57   :  { %962 = vmatpush3.bf16.msra.mxu0 %v1028_v5  ;;  %993 = vmatprep.subr.bf16.mxu1 %v1044_v13 }
  0x58   :  { %963 = vmatprep.subr.bf16.mxu0 %v1029_v6 }
  0x5a   :  { %994 = vmatpush3.bf16.msra.mxu1 %v1044_v13 }
  0x5b   :  { %964 = vmatpush3.bf16.msra.mxu0 %v1029_v6  ;;  %995 = vmatprep.subr.bf16.mxu1 %v1045_v16 }
  0x5c   :  { %965 = vmatprep.subr.bf16.mxu0 %v1030_v9 }
  0x5e   :  { %996 = vmatpush3.bf16.msra.mxu1 %v1045_v16 }
  0x5f   :  { %966 = vmatpush3.bf16.msra.mxu0 %v1030_v9  ;;  %997 = vmatprep.subr.bf16.mxu1 %v1046_v17 }
  0x60   :  { %967 = vmatprep.subr.bf16.mxu0 %v1031_v11 }
  0x62   :  { %998 = vmatpush3.bf16.msra.mxu1 %v1046_v17 }
  0x63   :  { %968 = vmatpush3.bf16.msra.mxu0 %v1031_v11  ;;  %999 = vmatprep.subr.bf16.mxu1 %v1047_v23 }
  0x66   :  { %970 = vmatmul.mubr.bf16.vlgmr.msra.gmra.mrb[0].mxu0 %v1033_v14  ;;  %1000 = vmatpush3.bf16.msra.mxu1 %v1047_v23 }
  0x67   :  { %973 = vmatprep.mubr.bf16.mxu0 %v1034_v15 }
  0x6e   :  { %974 = vmatmul.mubr.bf16.gmra.mrb[4].mxu0 %v1035_v18  ;;  %v1346_v18 = vstv %s73_s2 }
  0x6f   :  { %977 = vmatprep.mubr.bf16.mxu0 %v1036_v19 }
  0x76   :  { %978 = vmatmul.mubr.bf16.gmra.mrb[8].mxu0 %v1037_v20 }
  0x77   :  { %981 = vmatprep.mubr.bf16.mxu0 %v1038_v21 }
  0x7e   :  { %982 = vmatmul.mubr.bf16.gmra.mrb[12].mxu0 %v1039_v22 }
 0x139   :  { %v971_v24 = vpop.f32.mrb[0].mxu0 }
 0x13a   :  { %v237_v25 = vpop.f32.mrb[1].mxu0  ;;  %v302_v26 = vmul.f32 %v971_v24, %v971_v24 }
 0x13b   :  { %v972_v27 = vpop.f32.mrb[2].mxu0  ;;  %v300_v28 = vmul.f32 %v237_v25, %v237_v25 }
 0x13c   :  { %v397_v29 = vpack.c.bf16 %v972_v27, %v971_v24  ;;  %320 = vadd.xlane.f32.xlu1 %v302_v26  ;;  %v240_v30 = vpop.f32.mrb[3].mxu0  ;;  %v303_v32 = vmul.f32 %v972_v27, %v972_v27 }
 0x13d   :  { %316 = vadd.xlane.f32.xlu0 %v300_v28  ;;  %v396_v31 = vpack.c.bf16 %v240_v30, %v237_v25  ;;  %v301_v33 = vmul.f32 %v240_v30, %v240_v30 }
 0x13f   :  { %1001 = vmatprep.mubr.bf16.mxu1 %v396_v31 }
 0x140   :  { %322 = vadd.xlane.f32.xlu1 %v303_v32  ;;  %1002 = vmatmul.mubr.bf16.vlgmr.msra.gmra.mrb[0].mxu1 %v397_v29 }
 0x141   :  { %318 = vadd.xlane.f32.xlu0 %v301_v33  ;;  %v975_v34 = vpop.f32.mrb[4].mxu0 }
 0x142   :  { %v253_v35 = vpop.f32.mrb[5].mxu0  ;;  %v306_v36 = vmul.f32 %v975_v34, %v975_v34 }
 0x143   :  { %v976_v37 = vpop.f32.mrb[6].mxu0  ;;  %v304_v42 = vmul.f32 %v253_v35, %v253_v35 }
 0x144   :  { %v399_v38 = vpack.c.bf16 %v976_v37, %v975_v34  ;;  %v256_v39 = vpop.f32.mrb[7].mxu0  ;;  %v307_v40 = vmul.f32 %v976_v37, %v976_v37 }
 0x145   :  { %v398_v41 = vpack.c.bf16 %v256_v39, %v253_v35  ;;  %328 = vadd.xlane.f32.xlu0 %v306_v36  ;;  %v305_v43 = vmul.f32 %v256_v39, %v256_v39 }
 0x146   :  { %330 = vadd.xlane.f32.xlu1 %v307_v40 }
 0x147   :  { %1005 = vmatprep.mubr.bf16.mxu1 %v398_v41 }
 0x148   :  { %1006 = vmatmul.mubr.bf16.gmra.mrb[4].mxu1 %v399_v38 }
 0x149   :  { %324 = vadd.xlane.f32.xlu0 %v304_v42  ;;  %v979_v44 = vpop.f32.mrb[8].mxu0 }
 0x14a   :  { %326 = vadd.xlane.f32.xlu1 %v305_v43  ;;  %v269_v45 = vpop.f32.mrb[9].mxu0  ;;  %v310_v46 = vmul.f32 %v979_v44, %v979_v44 }
 0x14b   :  { %v980_v47 = vpop.f32.mrb[10].mxu0  ;;  %v308_v52 = vmul.f32 %v269_v45, %v269_v45 }
 0x14c   :  { %v401_v48 = vpack.c.bf16 %v980_v47, %v979_v44  ;;  %v272_v49 = vpop.f32.mrb[11].mxu0  ;;  %v311_v50 = vmul.f32 %v980_v47, %v980_v47 }
 0x14d   :  { %v400_v51 = vpack.c.bf16 %v272_v49, %v269_v45  ;;  %336 = vadd.xlane.f32.xlu0 %v310_v46  ;;  %v309_v53 = vmul.f32 %v272_v49, %v272_v49 }
 0x14e   :  { %338 = vadd.xlane.f32.xlu1 %v311_v50 }
 0x14f   :  { %1009 = vmatprep.mubr.bf16.mxu1 %v400_v51 }
 0x150   :  { %1010 = vmatmul.mubr.bf16.gmra.mrb[8].mxu1 %v401_v48 }
 0x151   :  { %332 = vadd.xlane.f32.xlu0 %v308_v52  ;;  %v983_v54 = vpop.f32.mrb[12].mxu0 }
 0x152   :  { %334 = vadd.xlane.f32.xlu1 %v309_v53  ;;  %v285_v55 = vpop.f32.mrb[13].mxu0  ;;  %v314_v62 = vmul.f32 %v983_v54, %v983_v54 }
 0x153   :  { %v984_v56 = vpop.f32.mrb[14].mxu0  ;;  %v312_v57 = vmul.f32 %v285_v55, %v285_v55 }
 0x154   :  { %v403_v58 = vpack.c.bf16 %v984_v56, %v983_v54  ;;  %v288_v59 = vpop.f32.mrb[15].mxu0  ;;  %v315_v63 = vmul.f32 %v984_v56, %v984_v56 }
 0x155   :  { %v313_v60 = vmul.f32 %v288_v59, %v288_v59  ;;  %v402_v61 = vpack.c.bf16 %v288_v59, %v285_v55  ;;  %340 = vadd.xlane.f32.xlu0 %v312_v57 }
 0x157   :  { %1013 = vmatprep.mubr.bf16.mxu1 %v402_v61  ;;  %342 = vadd.xlane.f32.xlu1 %v313_v60 }
 0x158   :  { %1014 = vmatmul.mubr.bf16.gmra.mrb[12].mxu1 %v403_v58 }
 0x159   :  { %344 = vadd.xlane.f32.xlu0 %v314_v62 }
 0x15b   :  { %346 = vadd.xlane.f32.xlu1 %v315_v63 }
 0x1c9   :  { %v321_v1 = vpop.xlane.xlu1 %320 }
 0x1ca   :  { %v317_v0 = vpop.xlane.xlu0 %316  ;;  %1048 = vrsqrt.f32 %v321_v1  ;;  %vm350_vm0 = vcmp.gt.f32.partialorder %v321_v1, 0.0 }
 0x1cb   :  { %1050 = vrsqrt.f32 %v317_v0  ;;  %vm348_vm1 = vcmp.gt.f32.partialorder %v317_v0, 0.0 }
 0x1cd   :  { %v323_v3 = vpop.xlane.xlu1 %322 }
 0x1ce   :  { %v319_v2 = vpop.xlane.xlu0 %318  ;;  %1052 = vrsqrt.f32 %v323_v3  ;;  %vm351_vm2 = vcmp.gt.f32.partialorder %v323_v3, 0.0 }
 0x1cf   :  { %1054 = vrsqrt.f32 %v319_v2  ;;  %vm349_vm3 = vcmp.gt.f32.partialorder %v319_v2, 0.0 }
 0x1d2   :  { %v329_v4 = vpop.xlane.xlu0 %328 }
 0x1d3   :  { %v1323_v5 = vpop.xlane.xlu1 %330  ;;  %1056 = vrsqrt.f32 %v329_v4  ;;  %vm354_vm4 = vcmp.gt.f32.partialorder %v329_v4, 0.0 }
 0x1d4   :  { %1058 = vrsqrt.f32 %v1323_v5  ;;  %v1049_v12 = vpop.eup %1048  ;;  %vm355_vm5 = vcmp.gt.f32.partialorder %v1323_v5, 0.0 }
 0x1d5   :  { %v1051_v13 = vpop.eup %1050  ;;  %v382_v19 = vsel %vm350_vm0, %v1049_v12, 0.0  ;;  %vm863_vm0 = vcmask 1041409  }
 0x1d6   :  { %v1325_v6 = vpop.xlane.xlu0 %324  ;;  %v380_v21 = vsel %vm348_vm1, %v1051_v13, 0.0  ;;  %v568_v28 = vmul.f32 %v1346_v18, %v382_v19  ;;  %vm865_vm1 = vcmask 1042434  }
 0x1d7   :  { %v1327_v7 = vpop.xlane.xlu1 %326  ;;  %1060 = vrsqrt.f32 %v1325_v6  ;;  %v566_v32 = vmul.f32 %v1346_v18, %v380_v21  ;;  %vm352_vm6 = vcmp.gt.f32.partialorder %v1325_v6, 0.0 }
 0x1d8   :  { %1062 = vrsqrt.f32 %v1327_v7  ;;  %v1053_v15 = vpop.eup %1052  ;;  %vm353_vm7 = vcmp.gt.f32.partialorder %v1327_v7, 0.0 }
 0x1d9   :  { %v1055_v17 = vpop.eup %1054  ;;  %v383_v20 = vsel %vm351_vm2, %v1053_v15, 0.0  ;;  %vm867_vm2 = vcmask 1043459  }
 0x1da   :  { %v1329_v8 = vpop.xlane.xlu0 %336  ;;  %v381_v22 = vsel %vm349_vm3, %v1055_v17, 0.0  ;;  %v569_v30 = vmul.f32 %v1346_v18, %v383_v20  ;;  %vm869_vm3 = vcmask 1044484  }
 0x1db   :  { %v1331_v9 = vpop.xlane.xlu1 %338  ;;  %1064 = vrsqrt.f32 %v1329_v8  ;;  %v567_v34 = vmul.f32 %v1346_v18, %v381_v22  ;;  %vm358_vm8 = vcmp.gt.f32.partialorder %v1329_v8, 0.0 }
 0x1dc   :  { %1066 = vrsqrt.f32 %v1331_v9  ;;  %vm359_vm9 = vcmp.gt.f32.partialorder %v1331_v9, 0.0 }
 0x1dd   :  { %v1057_v23 = vpop.eup %1056 }
 0x1de   :  { %v1333_v10 = vpop.xlane.xlu0 %332  ;;  %v1059_v26 = vpop.eup %1058  ;;  %v386_v40 = vsel %vm354_vm4, %v1057_v23, 0.0  ;;  %vm871_vm4 = vcmask 1045509  }
 0x1df   :  { %v1335_v11 = vpop.xlane.xlu1 %334  ;;  %1068 = vrsqrt.f32 %v1333_v10  ;;  %v387_v43 = vsel %vm355_vm5, %v1059_v26, 0.0  ;;  %vm356_vm10 = vcmp.gt.f32.partialorder %v1333_v10, 0.0  ;;  %v572_v52 = vmul.f32 %v1346_v18, %v386_v40 }
 0x1e0   :  { %1070 = vrsqrt.f32 %v1335_v11  ;;  %vm357_vm11 = vcmp.gt.f32.partialorder %v1335_v11, 0.0  ;;  %v573_v56 = vmul.f32 %v1346_v18, %v387_v43  ;;  %vm873_vm5 = vcmask 1046534  }
 0x1e1   :  { %v1061_v31 = vpop.eup %1060 }
 0x1e2   :  { %v1341_v14 = vpop.xlane.xlu0 %340  ;;  %v1063_v35 = vpop.eup %1062  ;;  %v384_v46 = vsel %vm352_vm6, %v1061_v31, 0.0  ;;  %vm875_vm6 = vcmask 1047559  }
 0x1e3   :  { %1072 = vrsqrt.f32 %v1341_v14  ;;  %v385_v47 = vsel %vm353_vm7, %v1063_v35, 0.0  ;;  %vm360_vm12 = vcmp.gt.f32.partialorder %v1341_v14, 0.0  ;;  %v570_v60 = vmul.f32 %v1346_v18, %v384_v46 }
 0x1e4   :  { %v1343_v16 = vpop.xlane.xlu1 %342  ;;  %v571_v61 = vmul.f32 %v1346_v18, %v385_v47 }
 0x1e5   :  { %1074 = vrsqrt.f32 %v1343_v16  ;;  %v1065_v39 = vpop.eup %1064  ;;  %vm361_vm13 = vcmp.gt.f32.partialorder %v1343_v16, 0.0 }
 0x1e6   :  { %v1352_v24 = vpop.xlane.xlu0 %344  ;;  %v1067_v45 = vpop.eup %1066  ;;  %v390_v50 = vsel %vm358_vm8, %v1065_v39, 0.0 }
 0x1e7   :  { %1076 = vrsqrt.f32 %v1352_v24  ;;  %v391_v63 = vsel %vm359_vm9, %v1067_v45, 0.0  ;;  %vm362_vm14 = vcmp.gt.f32.partialorder %v1352_v24, 0.0  ;;  %v576_v2 = vmul.f32 %v1346_v18, %v390_v50 }
 0x1e8   :  { %v1354_v27 = vpop.xlane.xlu1 %346  ;;  %v577_v23 = vmul.f32 %v1346_v18, %v391_v63 }
 0x1e9   :  { %1078 = vrsqrt.f32 %v1354_v27  ;;  %v1069_v49 = vpop.eup %1068  ;;  %vm363_vm15 = vcmp.gt.f32.partialorder %v1354_v27, 0.0 }
 0x1ea   :  { %v1071_v53 = vpop.eup %1070  ;;  %v388_v3 = vsel %vm356_vm10, %v1069_v49, 0.0 }
 0x1eb   :  { %v389_v8 = vsel %vm357_vm11, %v1071_v53, 0.0  ;;  %v574_v14 = vmul.f32 %v1346_v18, %v388_v3 }
 0x1ec   :  { %v575_v16 = vmul.f32 %v1346_v18, %v389_v8 }
 0x1ed   :  { %v1073_v57 = vpop.eup %1072 }
 0x1ee   :  { %v392_v17 = vsel %vm360_vm12, %v1073_v57, 0.0 }
 0x1ef   :  { %v1075_v62 = vpop.eup %1074  ;;  %v578_v31 = vmul.f32 %v1346_v18, %v392_v17 }
 0x1f0   :  { %v393_v10 = vsel %vm361_vm13, %v1075_v62, 0.0 }
 0x1f1   :  { %v1077_v15 = vpop.eup %1076 }
 0x1f2   :  { %v394_v27 = vsel %vm362_vm14, %v1077_v15, 0.0 }
 0x1f3   :  { %v1079_v21 = vpop.eup %1078 }
 0x213   :  { %v1003_v25 = vpop.f32.mrb[0].mxu1 }
 0x214   :  { %v502_v29 = vpop.f32.mrb[1].mxu1  ;;  %v1363_v36 = vmul.f32 %v1003_v25, %v568_v28 }
 0x215   :  { %v1004_v33 = vpop.f32.mrb[2].mxu1  ;;  %v1368_v41 = vmul.f32 %v566_v32, %v502_v29  ;;  %v579_v32 = vmul.f32 %v1346_v18, %v393_v10 }
 0x216   :  { %v1365_v37 = vmul.f32 %v1004_v33, %v569_v30  ;;  %v505_v38 = vpop.f32.mrb[3].mxu1  ;;  %v395_v33 = vsel %vm363_vm15, %v1079_v21, 0.0 }
 0x217   :  { %v1370_v42 = vmul.f32 %v567_v34, %v505_v38 }
 0x218   :  { %v605_v44 = vmax.f32 %v1363_v36, %v1365_v37 }
 0x219   :  { %v598_v48 = vmax.f32 %v1368_v41, %v1370_v42 }
 0x21a   :  { %v606_v51 = vrot.slane %v605_v44, 4 }
 0x21b   :  { %v599_v54 = vrot.slane %v598_v48, 4  ;;  %v1007_v55 = vpop.f32.mrb[4].mxu1 }
 0x21c   :  { %v607_v58 = vmax.f32 %v605_v44, %v606_v51  ;;  %v518_v59 = vpop.f32.mrb[5].mxu1  ;;  %v1393_v5 = vmul.f32 %v1007_v55, %v572_v52 }
 0x21d   :  { %v600_v0 = vmax.f32 %v598_v48, %v599_v54  ;;  %v1008_v1 = vpop.f32.mrb[6].mxu1  ;;  %v1399_v12 = vmul.f32 %v570_v60, %v518_v59 }
 0x21e   :  { %v608_v4 = vrot.slane %v607_v58, 2  ;;  %v1395_v6 = vmul.f32 %v1008_v1, %v573_v56  ;;  %v521_v7 = vpop.f32.mrb[7].mxu1 }
 0x21f   :  { %v601_v9 = vrot.slane %v600_v0, 2  ;;  %v1401_v13 = vmul.f32 %v571_v61, %v521_v7 }
 0x220   :  { %v609_v19 = vmax.f32 %v607_v58, %v608_v4  ;;  %v619_v20 = vmax.f32 %v1393_v5, %v1395_v6  ;;  %v581_v4 = vmul.f32 %v1346_v18, %v395_v33 }
 0x221   :  { %v602_v11 = vmax.f32 %v600_v0, %v601_v9  ;;  %v612_v22 = vmax.f32 %v1399_v12, %v1401_v13  ;;  %v580_v0 = vmul.f32 %v1346_v18, %v394_v27 }
 0x222   :  { %v610_v25 = vrot.slane %v609_v19, 1  ;;  %v620_v26 = vrot.slane %v619_v20, 4 }
 0x223   :  { %v603_v28 = vrot.slane %v602_v11, 1  ;;  %v613_v29 = vrot.slane %v612_v22, 4  ;;  %v1011_v30 = vpop.f32.mrb[8].mxu1 }
 0x224   :  { %v611_v34 = vmax.f32 %v609_v19, %v610_v25  ;;  %v621_v35 = vmax.f32 %v619_v20, %v620_v26  ;;  %v534_v38 = vpop.f32.mrb[9].mxu1  ;;  %v1419_v43 = vmul.f32 %v1011_v30, %v576_v2 }
 0x225   :  { %v604_v39 = vmax.f32 %v602_v11, %v603_v28  ;;  %v614_v40 = vmax.f32 %v612_v22, %v613_v29  ;;  %v1421_v44 = vmul.f32 %v574_v14, %v534_v38  ;;  %v1012_v45 = vpop.f32.mrb[10].mxu1 }
 0x226   :  { %v656_v46 = vsub.f32 %v1363_v36, %v611_v34  ;;  %v657_v47 = vsub.f32 %v1365_v37, %v611_v34  ;;  %v622_v48 = vrot.slane %v621_v35, 2  ;;  %v1425_v49 = vmul.f32 %v1012_v45, %v577_v23  ;;  %v537_v24 = vpop.f32.mrb[11].mxu1 }
 0x227   :  { %v654_v50 = vsub.f32 %v1368_v41, %v604_v39  ;;  %v655_v51 = vsub.f32 %v1370_v42, %v604_v39  ;;  %v615_v52 = vrot.slane %v614_v40, 2  ;;  %v1429_v53 = vmul.f32 %v575_v16, %v537_v24 }
 0x228   :  { %v674_v54 = vmul.f32 1.442695, %v656_v46  ;;  %v676_v55 = vmul.f32 1.442695, %v657_v47  ;;  %v623_v56 = vmax.f32 %v621_v35, %v622_v48  ;;  %v633_v57 = vmax.f32 %v1419_v43, %v1425_v49 }
 0x229   :  { %v670_v58 = vmul.f32 1.442695, %v654_v50  ;;  %v672_v59 = vmul.f32 1.442695, %v655_v51  ;;  %v616_v60 = vmax.f32 %v614_v40, %v615_v52  ;;  %v626_v61 = vmax.f32 %v1421_v44, %v1429_v53 }
 0x22a   :  { %1080 = vpow2.f32 %v674_v54  ;;  %v624_v62 = vrot.slane %v623_v56, 1  ;;  %v634_v63 = vrot.slane %v633_v57, 4 }
 0x22b   :  { %1082 = vpow2.f32 %v676_v55  ;;  %v617_v1 = vrot.slane %v616_v60, 1  ;;  %v627_v2 = vrot.slane %v626_v61, 4  ;;  %v1015_v3 = vpop.f32.mrb[12].mxu1 }
 0x22c   :  { %1084 = vpow2.f32 %v670_v58  ;;  %v625_v7 = vmax.f32 %v623_v56, %v624_v62  ;;  %v635_v8 = vmax.f32 %v633_v57, %v634_v63  ;;  %v1437_v9 = vmul.f32 %v1015_v3, %v580_v0  ;;  %v550_v15 = vpop.f32.mrb[13].mxu1 }
 0x22d   :  { %1086 = vpow2.f32 %v672_v59  ;;  %v618_v17 = vmax.f32 %v616_v60, %v617_v1  ;;  %v628_v10 = vmax.f32 %v626_v61, %v627_v2  ;;  %v1439_v19 = vmul.f32 %v578_v31, %v550_v15  ;;  %v1016_v20 = vpop.f32.mrb[14].mxu1 }
 0x22e   :  { %v660_v21 = vsub.f32 %v1393_v5, %v625_v7  ;;  %v661_v11 = vsub.f32 %v1395_v6, %v625_v7  ;;  %v636_v22 = vrot.slane %v635_v8, 2  ;;  %v1443_v23 = vmul.f32 %v1016_v20, %v581_v4  ;;  %v553_v18 = vpop.f32.mrb[15].mxu1 }
 0x22f   :  { %v658_v25 = vsub.f32 %v1399_v12, %v618_v17  ;;  %v659_v26 = vsub.f32 %v1401_v13, %v618_v17  ;;  %v629_v14 = vrot.slane %v628_v10, 2  ;;  %v1447_v16 = vmul.f32 %v579_v32, %v553_v18 }
 0x230   :  { %v682_v28 = vmul.f32 1.442695, %v660_v21  ;;  %v684_v29 = vmul.f32 1.442695, %v661_v11  ;;  %v637_v30 = vmax.f32 %v635_v8, %v636_v22  ;;  %v647_v31 = vmax.f32 %v1437_v9, %v1443_v23 }
 0x231   :  { %v678_v27 = vmul.f32 1.442695, %v658_v25  ;;  %v680_v33 = vmul.f32 1.442695, %v659_v26  ;;  %v630_v34 = vmax.f32 %v628_v10, %v629_v14  ;;  %v640_v35 = vmax.f32 %v1439_v19, %v1447_v16 }
 0x232   :  { %1088 = vpow2.f32 %v682_v28  ;;  %v638_v38 = vrot.slane %v637_v30, 1  ;;  %v648_v39 = vrot.slane %v647_v31, 4 }
 0x233   :  { %1090 = vpow2.f32 %v684_v29  ;;  %v631_v40 = vrot.slane %v630_v34, 1  ;;  %v641_v50 = vrot.slane %v640_v35, 4 }
 0x234   :  { %v1081_v45 = vpop.eup %1080  ;;  %1092 = vpow2.f32 %v678_v27  ;;  %v639_v32 = vmax.f32 %v637_v30, %v638_v38  ;;  %v649_v46 = vmax.f32 %v647_v31, %v648_v39 }
 0x235   :  { %v1083_v47 = vpop.eup %1082  ;;  %v704_v48 = vmul.f32 %v1081_v45, %v1363_v36  ;;  %1094 = vpow2.f32 %v680_v33  ;;  %v1454_v24 = vmax.f32 %v630_v34, %v631_v40  ;;  %v642_v15 = vmax.f32 %v640_v35, %v641_v50 }
 0x236   :  { %v1085_v51 = vpop.eup %1084  ;;  %v705_v52 = vmul.f32 %v1083_v47, %v1365_v37  ;;  %v781_v54 = vadd.f32 %v1083_v47, %v1081_v45  ;;  %v664_v55 = vsub.f32 %v1419_v43, %v639_v32  ;;  %v665_v56 = vsub.f32 %v1425_v49, %v639_v32 }
 0x237   :  { %v1087_v57 = vpop.eup %1086  ;;  %v702_v58 = vmul.f32 %v1085_v51, %v1368_v41  ;;  %v662_v59 = vsub.f32 %v1421_v44, %v1454_v24  ;;  %v663_v36 = vsub.f32 %v1429_v53, %v1454_v24  ;;  %v650_v60 = vrot.slane %v649_v46, 2 }
 0x238   :  { %v725_v61 = vadd.f32 %v705_v52, %v704_v48  ;;  %v782_v62 = vrot.slane %v781_v54, 4  ;;  %v703_v63 = vmul.f32 %v1087_v57, %v1370_v42  ;;  %v774_v37 = vadd.f32 %v1087_v57, %v1085_v51 }
 0x239   :  { %v690_v0 = vmul.f32 1.442695, %v664_v55  ;;  %v692_v1 = vmul.f32 1.442695, %v665_v56  ;;  %v651_v2 = vmax.f32 %v649_v46, %v650_v60  ;;  %v686_v41 = vmul.f32 1.442695, %v662_v59 }
 0x23a   :  { %v726_v3 = vrot.slane %v725_v61, 4  ;;  %v783_v4 = vadd.f32 %v782_v62, %v781_v54  ;;  %v718_v7 = vadd.f32 %v703_v63, %v702_v58  ;;  %v775_v8 = vrot.slane %v774_v37, 4 }
 0x23b   :  { %1096 = vpow2.f32 %v690_v0  ;;  %v652_v28 = vrot.slane %v651_v2, 1  ;;  %v643_v38 = vrot.slane %v642_v15, 2  ;;  %v688_v54 = vmul.f32 1.442695, %v663_v36 }
 0x23c   :  { %v1089_v17 = vpop.eup %1088  ;;  %v727_v10 = vadd.f32 %v726_v3, %v725_v61  ;;  %v784_v20 = vrot.slane %v783_v4, 2  ;;  %v719_v21 = vrot.slane %v718_v7, 4  ;;  %v776_v11 = vadd.f32 %v775_v8, %v774_v37 }
 0x23d   :  { %v1091_v22 = vpop.eup %1090  ;;  %v708_v18 = vmul.f32 %v1089_v17, %v1393_v5  ;;  %1098 = vpow2.f32 %v692_v1  ;;  %v653_v48 = vmax.f32 %v651_v2, %v652_v28  ;;  %v644_v61 = vmax.f32 %v642_v15, %v643_v38 }
 0x23e   :  { %v1093_v42 = vpop.eup %1092  ;;  %v785_v25 = vadd.f32 %v784_v20, %v783_v4  ;;  %v720_v26 = vadd.f32 %v719_v21, %v718_v7  ;;  %v777_v14 = vrot.slane %v776_v11, 2  ;;  %v709_v30 = vmul.f32 %v1091_v22, %v1395_v6 }
 0x23f   :  { %v1095_v29 = vpop.eup %1094  ;;  %v795_v31 = vadd.f32 %v1091_v22, %v1089_v17  ;;  %v706_v27 = vmul.f32 %v1093_v42, %v1399_v12  ;;  %1100 = vpow2.f32 %v686_v41  ;;  %v728_v33 = vrot.slane %v727_v10, 2 }
 0x240   :  { %v786_v34 = vrot.slane %v785_v25, 1  ;;  %v778_v35 = vadd.f32 %v777_v14, %v776_v11  ;;  %v739_v39 = vadd.f32 %v709_v30, %v708_v18  ;;  %v707_v5 = vmul.f32 %v1095_v29, %v1401_v13 }
 0x241   :  { %v796_v40 = vrot.slane %v795_v31, 4  ;;  %v788_v45 = vadd.f32 %v1095_v29, %v1093_v42  ;;  %v721_v46 = vrot.slane %v720_v26, 2  ;;  %v729_v51 = vadd.f32 %v728_v33, %v727_v10 }
 0x242   :  { %v787_v32 = vadd.f32 %v786_v34, %v785_v25  ;;  %v779_v47 = vrot.slane %v778_v35, 1  ;;  %v740_v6 = vrot.slane %v739_v39, 4  ;;  %v732_v50 = vadd.f32 %v707_v5, %v706_v27 }
 0x243   :  { %v797_v24 = vadd.f32 %v796_v40, %v795_v31  ;;  %v789_v12 = vrot.slane %v788_v45, 4  ;;  %v668_v60 = vsub.f32 %v1437_v9, %v653_v48  ;;  %v722_v63 = vadd.f32 %v721_v46, %v720_v26 }
 0x244   :  { %1102 = vrcp.f32 %v787_v32  ;;  %v780_v52 = vadd.f32 %v779_v47, %v778_v35  ;;  %v741_v56 = vadd.f32 %v740_v6, %v739_v39  ;;  %v733_v58 = vrot.slane %v732_v50, 4 }
 0x245   :  { %v1097_v55 = vpop.eup %1096  ;;  %v798_v57 = vrot.slane %v797_v24, 2  ;;  %v790_v13 = vadd.f32 %v789_v12, %v788_v45  ;;  %v669_v3 = vsub.f32 %v1443_v23, %v653_v48  ;;  %v730_v7 = vrot.slane %v729_v51, 1 }
 0x246   :  { %1104 = vrcp.f32 %v780_v52  ;;  %v712_v59 = vmul.f32 %v1097_v55, %v1419_v43  ;;  %v734_v0 = vadd.f32 %v733_v58, %v732_v50  ;;  %v742_v8 = vrot.slane %v741_v56, 2 }
 0x247   :  { %v1099_v62 = vpop.eup %1098  ;;  %v799_v37 = vadd.f32 %v798_v57, %v797_v24  ;;  %v791_v1 = vrot.slane %v790_v13, 2  ;;  %1106 = vpow2.f32 %v688_v54  ;;  %v698_v20 = vmul.f32 1.442695, %v668_v60 }
 0x248   :  { %v713_v2 = vmul.f32 %v1099_v62, %v1425_v49  ;;  %v809_v36 = vadd.f32 %v1099_v62, %v1097_v55  ;;  %v1477_v21 = vstv %s1469_s27  ;;  %v723_v11 = vrot.slane %v722_v63, 1 }
 0x249   :  { %v1101_v4 = vpop.eup %1100  ;;  %v800_v41 = vrot.slane %v799_v37, 1  ;;  %v792_v43 = vadd.f32 %v791_v1, %v790_v13  ;;  %v735_v49 = vrot.slane %v734_v0, 2  ;;  %1108 = vpow2.f32 %v698_v20 }
 0x24a   :  { %v753_v17 = vadd.f32 %v713_v2, %v712_v59  ;;  %v810_v10 = vrot.slane %v809_v36, 4  ;;  %v710_v15 = vmul.f32 %v1101_v4, %v1421_v44  ;;  %v700_v25 = vmul.f32 1.442695, %v669_v3 }
 0x24b   :  { %v801_v22 = vadd.f32 %v800_v41, %v799_v37  ;;  %v793_v18 = vrot.slane %v792_v43, 1  ;;  %v731_v26 = vadd.f32 %v730_v7, %v729_v51  ;;  %v743_v30 = vadd.f32 %v742_v8, %v741_v56 }
 0x24c   :  { %v811_v42 = vadd.f32 %v810_v10, %v809_v36  ;;  %v754_v28 = vrot.slane %v753_v17, 4  ;;  %v645_v27 = vrot.slane %v644_v61, 1  ;;  %v724_v33 = vadd.f32 %v723_v11, %v722_v63 }
 0x24d   :  { %1110 = vrcp.f32 %v801_v22  ;;  %v794_v14 = vadd.f32 %v793_v18, %v792_v43  ;;  %v736_v35 = vadd.f32 %v735_v49, %v734_v0  ;;  %v744_v46 = vrot.slane %v743_v30, 1 }
 0x24e   :  { %v1103_v29 = vpop.eup %1102  ;;  %v812_v31 = vrot.slane %v811_v42, 2  ;;  %1112 = vpow2.f32 %v700_v25  ;;  %v646_v39 = vmax.f32 %v644_v61, %v645_v27  ;;  %v755_v45 = vadd.f32 %v754_v28, %v753_v17 }
 0x24f   :  { %v839_v44 = vmul.f32 %v1103_v29, %v731_v26  ;;  %1114 = vrcp.f32 %v794_v14  ;;  %v737_v51 = vrot.slane %v736_v35, 1  ;;  %v745_v60 = vadd.f32 %v744_v46, %v743_v30 }
 0x250   :  { %v1105_v34 = vpop.eup %1104  ;;  %v813_v38 = vadd.f32 %v812_v31, %v811_v42  ;;  %v666_v48 = vsub.f32 %v1439_v19, %v646_v39  ;;  %v667_v6 = vsub.f32 %v1447_v16, %v646_v39  ;;  %v756_v56 = vrot.slane %v755_v45, 2 }
 0x251   :  { %v848_v40 = vmul.f32 %v1477_v21, %v839_v44  ;;  %v838_v5 = vmul.f32 %v1105_v34, %v724_v33  ;;  %v1107_v32 = vpop.eup %1106  ;;  %v738_v1 = vadd.f32 %v737_v51, %v736_v35 }
 0x252   :  { %v814_v47 = vrot.slane %v813_v38, 1  ;;  %v711_v50 = vmul.f32 %v1107_v32, %v1429_v53  ;;  %v802_v12 = vadd.f32 %v1107_v32, %v1101_v4  ;;  %v694_v54 = vmul.f32 1.442695, %v666_v48 }
 0x253   :  { %v847_v24 = vmul.f32 %v1477_v21, %v838_v5  ;;  %v696_v55 = vmul.f32 1.442695, %v667_v6  ;;  %v1109_v59 = vpop.eup %1108  ;;  %v757_v36 = vadd.f32 %v756_v56, %v755_v45 }
 0x254   :  { %v815_v52 = vadd.f32 %v814_v47, %v813_v38  ;;  %v746_v57 = vadd.f32 %v711_v50, %v710_v15  ;;  %v803_v58 = vrot.slane %v802_v12, 4  ;;  %1116 = vpow2.f32 %v694_v54 }
 0x255   :  { %v864_v13 = vsel %vm863_vm0, %v848_v40, %v847_v24  ;;  %v716_v37 = vmul.f32 %v1109_v59, %v1437_v9  ;;  %1118 = vpow2.f32 %v696_v55  ;;  %v758_v9 = vrot.slane %v757_v36, 1 }
 0x256   :  { %v747_v62 = vrot.slane %v746_v57, 4  ;;  %v804_v63 = vadd.f32 %v803_v58, %v802_v12  ;;  %1120 = vrcp.f32 %v815_v52 }
 0x257   :  { %v1111_v61 = vpop.eup %1110  ;;  %v759_v29 = vadd.f32 %v758_v9, %v757_v36 }
 0x258   :  { %v1113_v53 = vpop.eup %1112  ;;  %v841_v0 = vmul.f32 %v1111_v61, %v745_v60  ;;  %v805_v3 = vrot.slane %v804_v63, 2  ;;  %v748_v41 = vadd.f32 %v747_v62, %v746_v57 }
 0x259   :  { %v1115_v2 = vpop.eup %1114  ;;  %v717_v4 = vmul.f32 %v1113_v53, %v1443_v23  ;;  %v823_v7 = vadd.f32 %v1113_v53, %v1109_v59 }
 0x25a   :  { %v840_v8 = vmul.f32 %v1115_v2, %v738_v1  ;;  %v806_v43 = vadd.f32 %v805_v3, %v804_v63  ;;  %v749_v18 = vrot.slane %v748_v41, 2  ;;  %v850_v49 = vmul.f32 %v1477_v21, %v841_v0 }
 0x25b   :  { %v767_v17 = vadd.f32 %v717_v4, %v716_v37  ;;  %v824_v10 = vrot.slane %v823_v7, 4 }
 0x25c   :  { %v849_v15 = vmul.f32 %v1477_v21, %v840_v8  ;;  %v807_v20 = vrot.slane %v806_v43, 1  ;;  %v750_v44 = vadd.f32 %v749_v18, %v748_v41 }
 0x25d   :  { %v768_v11 = vrot.slane %v767_v17, 4  ;;  %v825_v22 = vadd.f32 %v824_v10, %v823_v7 }
 0x25e   :  { %v866_v42 = vsel %vm865_vm1, %v849_v15, %v864_v13  ;;  %v808_v25 = vadd.f32 %v807_v20, %v806_v43  ;;  %v1117_v26 = vpop.eup %1116  ;;  %v751_v32 = vrot.slane %v750_v44, 1 }
 0x25f   :  { %v826_v23 = vrot.slane %v825_v22, 2  ;;  %v868_v14 = vsel %vm867_vm2, %v850_v49, %v866_v42  ;;  %v1119_v28 = vpop.eup %1118  ;;  %v769_v30 = vadd.f32 %v768_v11, %v767_v17  ;;  %v714_v31 = vmul.f32 %v1117_v26, %v1439_v19 }
 0x260   :  { %1122 = vrcp.f32 %v808_v25  ;;  %v1121_v27 = vpop.eup %1120  ;;  %v715_v33 = vmul.f32 %v1119_v28, %v1447_v16  ;;  %v816_v34 = vadd.f32 %v1119_v28, %v1117_v26  ;;  %v752_v19 = vadd.f32 %v751_v32, %v750_v44 }
 0x261   :  { %v827_v35 = vadd.f32 %v826_v23, %v825_v22  ;;  %v843_v38 = vmul.f32 %v1121_v27, %v759_v29  ;;  %v770_v45 = vrot.slane %v769_v30, 2 }
 0x262   :  { %v760_v39 = vadd.f32 %v715_v33, %v714_v31  ;;  %v817_v40 = vrot.slane %v816_v34, 4 }
 0x263   :  { %v828_v5 = vrot.slane %v827_v35, 1  ;;  %v771_v24 = vadd.f32 %v770_v45, %v769_v30  ;;  %v852_v58 = vmul.f32 %v1477_v21, %v843_v38 }
 0x264   :  { %v761_v46 = vrot.slane %v760_v39, 4  ;;  %v818_v47 = vadd.f32 %v817_v40, %v816_v34 }
 0x265   :  { %v829_v48 = vadd.f32 %v828_v5, %v827_v35  ;;  %v772_v55 = vrot.slane %v771_v24, 1 }
 0x266   :  { %v819_v6 = vrot.slane %v818_v47, 2  ;;  %v762_v50 = vadd.f32 %v761_v46, %v760_v39 }
 0x267   :  { %1124 = vrcp.f32 %v829_v48  ;;  %v773_v60 = vadd.f32 %v772_v55, %v771_v24 }
 0x268   :  { %v820_v12 = vadd.f32 %v819_v6, %v818_v47  ;;  %v763_v54 = vrot.slane %v762_v50, 2 }
 0x26a   :  { %v1123_v51 = vpop.eup %1122  ;;  %v821_v52 = vrot.slane %v820_v12, 1  ;;  %v764_v59 = vadd.f32 %v763_v54, %v762_v50 }
 0x26b   :  { %v842_v16 = vmul.f32 %v1123_v51, %v752_v19 }
 0x26c   :  { %v822_v56 = vadd.f32 %v821_v52, %v820_v12  ;;  %v765_v37 = vrot.slane %v764_v59, 1 }
 0x26d   :  { %v851_v57 = vmul.f32 %v1477_v21, %v842_v16 }
 0x26e   :  { %1126 = vrcp.f32 %v822_v56  ;;  %v766_v53 = vadd.f32 %v765_v37, %v764_v59 }
 0x26f   :  { %v870_v13 = vsel %vm869_vm3, %v851_v57, %v868_v14 }
 0x270   :  { %v872_v61 = vsel %vm871_vm4, %v852_v58, %v870_v13 }
 0x271   :  { %v1125_v62 = vpop.eup %1124 }
 0x272   :  { %v845_v63 = vmul.f32 %v1125_v62, %v773_v60 }
 0x274   :  { %v854_v36 = vmul.f32 %v1477_v21, %v845_v63 }
 0x278   :  { %v1127_v0 = vpop.eup %1126 }
 0x279   :  { %v844_v1 = vmul.f32 %v1127_v0, %v766_v53 }
 0x27b   :  { %v853_v2 = vmul.f32 %v1477_v21, %v844_v1 }
 0x27d   :  { %v874_v3 = vsel %vm873_vm5, %v853_v2, %v872_v61 }
 0x27e   :  { %v876_v4 = vsel %vm875_vm6, %v854_v36, %v874_v3 }
 0x27f   :  { %878 = vst [vmem:[#allocation10] sm:$0xff] %v876_v4 }
 0x280   :  { %1217 = shalt.err (!%p1214_p5)
}
 0x281   :  { %s1218_s9 = scalar_lea.hbm %s1511_s4, 128 }
 0x282   :  { %p1219_p6 = scmp.ne.s32.totalorder %s1511_s4, %s1218_s9  ;;  %p1222_p7 = scmp.lt.u32.totalorder %s1218_s9, %s1511_s4 }
 0x284   :  { %p1224_p8 = pnand %p1222_p7, %p1219_p6 }
 0x286   :  { %1227 = shalt.err (!%p1224_p8)
}
 0x287   :  { %888 = dma.vmem_to_hbm [thread:$0]  %s886_s5, 128, %s1511_s4, [#allocation4]  }
 0x288   :  { %1234 = dma.done.wait [#allocation4], 128  }
 0x289   :  { %1235 = vsyncadd [#allocation4], 4294967168 }
 0x28a   :  { %892 = vsyncpa [#allocation3], 1 }
 0x28b   :  { %893 = vsyncpa [#allocation7], 1 }
 0x28c   :  { %894 = vsyncpa [#allocation4], 1 }
 0x28d   :  { %895 = vsyncpa [#allocation5], 1 }

</bundles_post_ra>
